<compile_context>
chip_gen: v7x
topology: tpu7x:2x2x1
jax: 0.10.0
libtpu: 0.0.40
codegen_flags: <defaults>
</compile_context>

<pallas_src>
import functools

import jax
import jax.numpy as jnp
import numpy as np
from jax.experimental import pallas as pl
from jax.experimental.pallas import tpu as pltpu


def _cdiv(a, b):
    return (a + b - 1) // b


def _round_up(n, m):
    return ((n + m - 1) // m) * m


# ---------------------------------------------------------------------------
# Kernel body: four lane-dense GEMMs + ReLUs, nothing else.
# ---------------------------------------------------------------------------
def _dqn_kernel(x_ref, w1_ref, b1_ref, w2_ref, b2_ref,
                wf1_ref, bf1_ref, wf2_ref, bf2_ref, out_ref):
    x = x_ref[...]                                               # [TB, 50]
    h1 = jnp.maximum(
        jnp.dot(x, w1_ref[...], preferred_element_type=jnp.float32)
        + b1_ref[...], 0.0)                                      # [TB, 768]
    h2 = jnp.maximum(
        jnp.dot(h1, w2_ref[...], preferred_element_type=jnp.float32)
        + b2_ref[...], 0.0)                                      # [TB, 384]
    h3 = jnp.maximum(
        jnp.dot(h2, wf1_ref[...], preferred_element_type=jnp.float32)
        + bf1_ref[...], 0.0)                                     # [TB, 128]
    out_ref[...] = (
        jnp.dot(h3, wf2_ref[...], preferred_element_type=jnp.float32)
        + bf2_ref[...])                                          # [TB, 128]


# ---------------------------------------------------------------------------
# One-time host-side parameter repack (PyTorch layouts -> dense GEMM weights).
# ---------------------------------------------------------------------------
def prepack_dqn_params(params):
    """Returns (packed_device_arrays, num_actions). Call once; reuse."""
    w1, b1, w2, b2, fw1, fb1, fw2, fb2 = params
    A = int(np.asarray(fw2).shape[0])

    # conv1 (1->32, k=3, VALID on 10x5) as dense [50, 768]:
    #   row = h_in*5 + w_in, col = h_out*96 + w_out*32 + oc,
    #   zero outside each 3x3 window.
    w1_np = np.asarray(w1, np.float32)                           # [32,1,3,3] OIHW
    W1 = np.zeros((50, 768), np.float32)
    for h_out in range(8):
        for w_out in range(3):
            c0 = h_out * 96 + w_out * 32
            for kh in range(3):
                for kw in range(3):
                    r = (h_out + kh) * 5 + (w_out + kw)
                    W1[r, c0:c0 + 32] = w1_np[:, 0, kh, kw]
    B1 = np.tile(np.asarray(b1, np.float32), 24).reshape(1, 768)

    # conv2 (32->64, k=3, VALID on 8x3) as dense [768, 384]:
    #   row = h1*96 + kw*32 + ic (conv1 output layout), col = h_out*64 + oc.
    w2_np = np.asarray(w2, np.float32)                           # [64,32,3,3] OIHW
    W2 = np.zeros((768, 384), np.float32)
    for h_out in range(6):
        c0 = h_out * 64
        for kh in range(3):
            for kw in range(3):
                r0 = (h_out + kh) * 96 + kw * 32
                W2[r0:r0 + 32, c0:c0 + 64] = w2_np[:, :, kh, kw].T   # [ic, oc]
    B2 = np.tile(np.asarray(b2, np.float32), 6).reshape(1, 384)

    # fc1 (384->128): rows permuted from PyTorch's channel-major flatten
    # (idx = oc*6 + h) to the kernel's (idx = h*64 + oc) layout.
    fw1_np = np.asarray(fw1, np.float32)                         # [128, 384]
    WF1 = np.transpose(fw1_np.reshape(128, 64, 6), (2, 1, 0)).reshape(384, 128)
    BF1 = np.asarray(fb1, np.float32).reshape(1, 128)

    # fc2 (128->A): zero-padded to 128 output lanes for a lane-dense writeback.
    A_pad = 128
    WF2 = np.zeros((128, A_pad), np.float32)
    WF2[:, :A] = np.asarray(fw2, np.float32).T
    BF2 = np.zeros((1, A_pad), np.float32)
    BF2[0, :A] = np.asarray(fb2, np.float32)

    packed = tuple(jnp.asarray(a) for a in (W1, B1, W2, B2, WF1, BF1, WF2, BF2))
    return packed, A


# ---------------------------------------------------------------------------
# Jitted forward on prepacked weights.
# ---------------------------------------------------------------------------
@functools.partial(jax.jit, static_argnames=("num_actions", "max_batch_tile"))
def dqn_forward_prepacked(x_nchw, packed, *, num_actions, max_batch_tile=256):
    """x_nchw: [B, 1, 10, 5] float32. packed: output of prepack_dqn_params."""
    W1, B1, W2, B2, WF1, BF1, WF2, BF2 = packed
    B = x_nchw.shape[0]
    A_pad = WF2.shape[1]

    # Adaptive batch tiling: >= 2 grid steps (v7x megacore) + minimal padding.
    n_steps = max(2, _cdiv(B, max_batch_tile))
    TB = _round_up(_cdiv(B, n_steps), 8)
    B_pad = TB * n_steps

    x50 = x_nchw.reshape(B, 50)                                  # lane-dense input
    if B_pad != B:
        x50 = jnp.pad(x50, ((0, B_pad - B), (0, 0)))

    const2 = lambda i: (0, 0)
    out = pl.pallas_call(
        _dqn_kernel,
        out_shape=jax.ShapeDtypeStruct((B_pad, A_pad), jnp.float32),
        grid_spec=pltpu.PrefetchScalarGridSpec(
            num_scalar_prefetch=0,
            grid=(n_steps,),
            in_specs=[
                pl.BlockSpec((TB, 50), lambda i: (i, 0)),        # input tile
                pl.BlockSpec((50, 768), const2),                 # conv1 dense W
                pl.BlockSpec((1, 768), const2),                  # conv1 dense b
                pl.BlockSpec((768, 384), const2),                # conv2 dense W
                pl.BlockSpec((1, 384), const2),                  # conv2 dense b
                pl.BlockSpec((384, 128), const2),                # fc1 W
                pl.BlockSpec((1, 128), const2),                  # fc1 b
                pl.BlockSpec((128, A_pad), const2),              # fc2 W (padded)
                pl.BlockSpec((1, A_pad), const2),                # fc2 b (padded)
            ],
            out_specs=pl.BlockSpec((TB, A_pad), lambda i: (i, 0)),
        ),
        compiler_params=pltpu.CompilerParams(
            dimension_semantics=("parallel",),
            vmem_limit_bytes=32 * 1024 * 1024),
    )(x50, W1, B1, W2, B2, WF1, BF1, WF2, BF2)

    return out[:B, :num_actions]


def dqn_forward(x_nchw, params, *, max_batch_tile=256):
    """Convenience path: prepack (once per call) + run. Prefer prepacking
    outside the loop for RL inference."""
    packed, A = prepack_dqn_params(params)
    return dqn_forward_prepacked(x_nchw, packed, num_actions=A,
                                 max_batch_tile=max_batch_tile)


# ---------------------------------------------------------------------------
# Pure-JAX reference mirroring the PyTorch forward (NCHW / OIHW).
# ---------------------------------------------------------------------------
def dqn_reference(x_nchw, params):
    w1, b1, w2, b2, fw1, fb1, fw2, fb2 = params
    y = jax.lax.conv_general_dilated(
        x_nchw, w1, (1, 1), 'VALID',
        dimension_numbers=('NCHW', 'OIHW', 'NCHW')) + b1[None, :, None, None]
    y = jnp.maximum(y, 0.0)
    y = jax.lax.conv_general_dilated(
        y, w2, (1, 1), 'VALID',
        dimension_numbers=('NCHW', 'OIHW', 'NCHW')) + b2[None, :, None, None]
    y = jnp.maximum(y, 0.0)
    y = y.reshape(y.shape[0], -1)                                # channel-major flatten
    y = jnp.maximum(y @ fw1.T + fb1, 0.0)
    return y @ fw2.T + fb2


if __name__ == "__main__":
    num_actions = 6
    B = 2

    key = jax.random.PRNGKey(0)
    ks = jax.random.split(key, 9)
    # Deterministic synthetic parameters in PyTorch layouts.
    w1 = 0.1 * jax.random.normal(ks[0], (32, 1, 3, 3), jnp.float32)        # conv1.weight
    b1 = 0.1 * jax.random.normal(ks[1], (32,), jnp.float32)                # conv1.bias
    w2 = 0.1 * jax.random.normal(ks[2], (64, 32, 3, 3), jnp.float32)       # conv2.weight
    b2 = 0.1 * jax.random.normal(ks[3], (64,), jnp.float32)                # conv2.bias
    fw1 = 0.1 * jax.random.normal(ks[4], (128, 64 * 6 * 1), jnp.float32)   # fc1.weight
    fb1 = 0.1 * jax.random.normal(ks[5], (128,), jnp.float32)              # fc1.bias
    fw2 = 0.1 * jax.random.normal(ks[6], (num_actions, 128), jnp.float32)  # fc2.weight
    fb2 = 0.1 * jax.random.normal(ks[7], (num_actions,), jnp.float32)      # fc2.bias
    params = (w1, b1, w2, b2, fw1, fb1, fw2, fb2)

    x = jax.random.normal(ks[8], (B, 1, 10, 5), jnp.float32)               # NCHW input

    packed, A = prepack_dqn_params(params)                                 # one-time
    out = dqn_forward_prepacked(x, packed, num_actions=A)
    out = jax.block_until_ready(out)
    assert out.shape == (B, num_actions)

    ref = dqn_reference(x, params)
    np.testing.assert_allclose(np.asarray(out), np.asarray(ref),
                               rtol=1e-4, atol=1e-4)
    print("KERNEL_OK")
</pallas_src>

<mosaic_0001>
module attributes {stable_mosaic.version = 11 : i64} {
  func.func @_dqn_kernel(%arg0: i32, %arg1: memref<8x50xf32, #tpu.memory_space<vmem>>, %arg2: memref<50x768xf32, #tpu.memory_space<vmem>>, %arg3: memref<1x768xf32, #tpu.memory_space<vmem>>, %arg4: memref<768x384xf32, #tpu.memory_space<vmem>>, %arg5: memref<1x384xf32, #tpu.memory_space<vmem>>, %arg6: memref<384x128xf32, #tpu.memory_space<vmem>>, %arg7: memref<1x128xf32, #tpu.memory_space<vmem>>, %arg8: memref<128x128xf32, #tpu.memory_space<vmem>>, %arg9: memref<1x128xf32, #tpu.memory_space<vmem>>, %arg10: memref<8x128xf32, #tpu.memory_space<vmem>>) attributes {dimension_semantics = [#tpu.dimension_semantics<parallel>], iteration_bounds = array<i64: 2>, scalar_prefetch = 0 : i64, scratch_operands = 0 : i64, tpu.core_type = #tpu.core_type<tc>, window_params = [{transform_indices = @transform_0, window_bounds = array<i64: 8, 50>}, {pipeline_mode = #tpu.pipeline_mode<synchronous>, transform_indices = @transform_1, window_bounds = array<i64: 50, 768>}, {pipeline_mode = #tpu.pipeline_mode<synchronous>, transform_indices = @transform_2, window_bounds = array<i64: 1, 768>}, {pipeline_mode = #tpu.pipeline_mode<synchronous>, transform_indices = @transform_3, window_bounds = array<i64: 768, 384>}, {pipeline_mode = #tpu.pipeline_mode<synchronous>, transform_indices = @transform_4, window_bounds = array<i64: 1, 384>}, {pipeline_mode = #tpu.pipeline_mode<synchronous>, transform_indices = @transform_5, window_bounds = array<i64: 384, 128>}, {pipeline_mode = #tpu.pipeline_mode<synchronous>, transform_indices = @transform_6, window_bounds = array<i64: 1, 128>}, {pipeline_mode = #tpu.pipeline_mode<synchronous>, transform_indices = @transform_7, window_bounds = array<i64: 128, 128>}, {pipeline_mode = #tpu.pipeline_mode<synchronous>, transform_indices = @transform_8, window_bounds = array<i64: 1, 128>}, {transform_indices = @transform_9, window_bounds = array<i64: 8, 128>}]} {
    %c0 = arith.constant 0 : index
    %c0_0 = arith.constant 0 : index
    %0 = vector.load %arg1[%c0, %c0_0] : memref<8x50xf32, #tpu.memory_space<vmem>>, vector<8x50xf32>
    %c0_1 = arith.constant 0 : index
    %c0_2 = arith.constant 0 : index
    %1 = vector.load %arg2[%c0_1, %c0_2] : memref<50x768xf32, #tpu.memory_space<vmem>>, vector<50x768xf32>
    %cst = arith.constant dense<0.000000e+00> : vector<8x768xf32>
    %2 = tpu.matmul %0, %1, %cst {dimension_numbers = #tpu.dot_dimension_numbers<[1], [0], [0], [1], [0, 0, 1, 1], [], []>} : vector<8x50xf32>, vector<50x768xf32>, vector<8x768xf32> -> vector<8x768xf32>
    %c0_3 = arith.constant 0 : index
    %c0_4 = arith.constant 0 : index
    %3 = vector.load %arg3[%c0_3, %c0_4] : memref<1x768xf32, #tpu.memory_space<vmem>>, vector<1x768xf32>
    %4 = vector.broadcast %3 : vector<1x768xf32> to vector<8x768xf32>
    %5 = arith.addf %2, %4 : vector<8x768xf32>
    %cst_5 = arith.constant 0.000000e+00 : f32
    %6 = vector.broadcast %cst_5 : f32 to vector<8x768xf32>
    %7 = arith.maximumf %5, %6 : vector<8x768xf32>
    %c0_6 = arith.constant 0 : index
    %c0_7 = arith.constant 0 : index
    %8 = vector.load %arg4[%c0_6, %c0_7] : memref<768x384xf32, #tpu.memory_space<vmem>>, vector<768x384xf32>
    %cst_8 = arith.constant dense<0.000000e+00> : vector<8x384xf32>
    %9 = tpu.matmul %7, %8, %cst_8 {dimension_numbers = #tpu.dot_dimension_numbers<[1], [0], [0], [1], [0, 0, 1, 1], [], []>} : vector<8x768xf32>, vector<768x384xf32>, vector<8x384xf32> -> vector<8x384xf32>
    %c0_9 = arith.constant 0 : index
    %c0_10 = arith.constant 0 : index
    %10 = vector.load %arg5[%c0_9, %c0_10] : memref<1x384xf32, #tpu.memory_space<vmem>>, vector<1x384xf32>
    %11 = vector.broadcast %10 : vector<1x384xf32> to vector<8x384xf32>
    %12 = arith.addf %9, %11 : vector<8x384xf32>
    %cst_11 = arith.constant 0.000000e+00 : f32
    %13 = vector.broadcast %cst_11 : f32 to vector<8x384xf32>
    %14 = arith.maximumf %12, %13 : vector<8x384xf32>
    %c0_12 = arith.constant 0 : index
    %c0_13 = arith.constant 0 : index
    %15 = vector.load %arg6[%c0_12, %c0_13] : memref<384x128xf32, #tpu.memory_space<vmem>>, vector<384x128xf32>
    %cst_14 = arith.constant dense<0.000000e+00> : vector<8x128xf32>
    %16 = tpu.matmul %14, %15, %cst_14 {dimension_numbers = #tpu.dot_dimension_numbers<[1], [0], [0], [1], [0, 0, 1, 1], [], []>} : vector<8x384xf32>, vector<384x128xf32>, vector<8x128xf32> -> vector<8x128xf32>
    %c0_15 = arith.constant 0 : index
    %c0_16 = arith.constant 0 : index
    %17 = vector.load %arg7[%c0_15, %c0_16] : memref<1x128xf32, #tpu.memory_space<vmem>>, vector<1x128xf32>
    %18 = vector.broadcast %17 : vector<1x128xf32> to vector<8x128xf32>
    %19 = arith.addf %16, %18 : vector<8x128xf32>
    %cst_17 = arith.constant 0.000000e+00 : f32
    %20 = vector.broadcast %cst_17 : f32 to vector<8x128xf32>
    %21 = arith.maximumf %19, %20 : vector<8x128xf32>
    %c0_18 = arith.constant 0 : index
    %c0_19 = arith.constant 0 : index
    %22 = vector.load %arg8[%c0_18, %c0_19] : memref<128x128xf32, #tpu.memory_space<vmem>>, vector<128x128xf32>
    %cst_20 = arith.constant dense<0.000000e+00> : vector<8x128xf32>
    %23 = tpu.matmul %21, %22, %cst_20 {dimension_numbers = #tpu.dot_dimension_numbers<[1], [0], [0], [1], [0, 0, 1, 1], [], []>} : vector<8x128xf32>, vector<128x128xf32>, vector<8x128xf32> -> vector<8x128xf32>
    %c0_21 = arith.constant 0 : index
    %c0_22 = arith.constant 0 : index
    %24 = vector.load %arg9[%c0_21, %c0_22] : memref<1x128xf32, #tpu.memory_space<vmem>>, vector<1x128xf32>
    %25 = vector.broadcast %24 : vector<1x128xf32> to vector<8x128xf32>
    %26 = arith.addf %23, %25 : vector<8x128xf32>
    %c0_23 = arith.constant 0 : index
    %c0_24 = arith.constant 0 : index
    %27 = vector.load %arg10[%c0_23, %c0_24] : memref<8x128xf32, #tpu.memory_space<vmem>>, vector<8x128xf32>
    tpu.vector_store %arg10[%c0_23, %c0_24], %26 {strides = array<i32>} : memref<8x128xf32, #tpu.memory_space<vmem>>, vector<8x128xf32>,
    return
  }
  func.func @transform_0(%arg0: i32) -> (i32, i32) {
    %c0_i32 = arith.constant 0 : i32
    %c0_i32_0 = arith.constant 0 : i32
    return %arg0, %c0_i32 : i32, i32
  }
  func.func @transform_1(%arg0: i32) -> (i32, i32) {
    %c0_i32 = arith.constant 0 : i32
    %c0_i32_0 = arith.constant 0 : i32
    %c0_i32_1 = arith.constant 0 : i32
    return %c0_i32, %c0_i32_0 : i32, i32
  }
  func.func @transform_2(%arg0: i32) -> (i32, i32) {
    %c0_i32 = arith.constant 0 : i32
    %c0_i32_0 = arith.constant 0 : i32
    %c0_i32_1 = arith.constant 0 : i32
    return %c0_i32, %c0_i32_0 : i32, i32
  }
  func.func @transform_3(%arg0: i32) -> (i32, i32) {
    %c0_i32 = arith.constant 0 : i32
    %c0_i32_0 = arith.constant 0 : i32
    %c0_i32_1 = arith.constant 0 : i32
    return %c0_i32, %c0_i32_0 : i32, i32
  }
  func.func @transform_4(%arg0: i32) -> (i32, i32) {
    %c0_i32 = arith.constant 0 : i32
    %c0_i32_0 = arith.constant 0 : i32
    %c0_i32_1 = arith.constant 0 : i32
    return %c0_i32, %c0_i32_0 : i32, i32
  }
  func.func @transform_5(%arg0: i32) -> (i32, i32) {
    %c0_i32 = arith.constant 0 : i32
    %c0_i32_0 = arith.constant 0 : i32
    %c0_i32_1 = arith.constant 0 : i32
    return %c0_i32, %c0_i32_0 : i32, i32
  }
  func.func @transform_6(%arg0: i32) -> (i32, i32) {
    %c0_i32 = arith.constant 0 : i32
    %c0_i32_0 = arith.constant 0 : i32
    %c0_i32_1 = arith.constant 0 : i32
    return %c0_i32, %c0_i32_0 : i32, i32
  }
  func.func @transform_7(%arg0: i32) -> (i32, i32) {
    %c0_i32 = arith.constant 0 : i32
    %c0_i32_0 = arith.constant 0 : i32
    %c0_i32_1 = arith.constant 0 : i32
    return %c0_i32, %c0_i32_0 : i32, i32
  }
  func.func @transform_8(%arg0: i32) -> (i32, i32) {
    %c0_i32 = arith.constant 0 : i32
    %c0_i32_0 = arith.constant 0 : i32
    %c0_i32_1 = arith.constant 0 : i32
    return %c0_i32, %c0_i32_0 : i32, i32
  }
  func.func @transform_9(%arg0: i32) -> (i32, i32) {
    %c0_i32 = arith.constant 0 : i32
    %c0_i32_0 = arith.constant 0 : i32
    return %arg0, %c0_i32 : i32, i32
  }
}

</mosaic_0001>

<bundles_post_ra>
// kernel: dqn_forward_prepacked.1
= control target key start
LH: loop header
LB: loop body
LE: loop exit
PB: predicated region body
PF: predicated region fallthrough
CT: control target
= control target key end

     0   :  { %14 = vsyncpa [#allocation3], 0  ;;  %s3354_s0 = inlined_call_operand.vmem [shape: f32[16,50], index: 0, kind: input, shape index: {}]   ;;  %s3355_s1 = inlined_call_operand.hbm [shape: f32[50,768], index: 1, kind: input, shape index: {}]   ;;  %s3356_s2 = inlined_call_operand.hbm [shape: f32[1,768], index: 2, kind: input, shape index: {}]   ;;  %s3357_s3 = inlined_call_operand.hbm [shape: f32[768,384], index: 3, kind: input, shape index: {}]   ;;  %s3358_s4 = inlined_call_operand.hbm [shape: f32[1,384], index: 4, kind: input, shape index: {}]   ;;  %s3359_s5 = inlined_call_operand.hbm [shape: f32[384,128], index: 5, kind: input, shape index: {}]   ;;  %s3360_s6 = inlined_call_operand.hbm [shape: f32[1,128], index: 6, kind: input, shape index: {}]   ;;  %s3361_s7 = inlined_call_operand.hbm [shape: f32[128,128], index: 7, kind: input, shape index: {}]   ;;  %s3362_s8 = inlined_call_operand.hbm [shape: f32[1,128], index: 8, kind: input, shape index: {}]   ;;  %s3363_s9 = inlined_call_operand.vmem [shape: f32[16,128], index: 9, kind: output, shape index: {}]  }
   0x1   :  { %15 = vsyncpa [#allocation5], 0 }
   0x2   :  { %16 = vsyncpa [#allocation8], 0 }
   0x3   :  { %17 = vsyncpa [#allocation11], 0 }
   0x4   :  { %18 = vsyncpa [#allocation14], 0  ;;  %s3014_s30 = smov 0  }
   0x5 LB: > { %s2947_s10 = smov [#allocation4]   ;;  %s3020_s12 = sadd.s32 4294967295, %s2945_s30   ;;  %s2945_s30 = sphi %s3014_s30, %s24_s30  }
   0x6   : > { %s275_s11 = sshll.u32 %s2947_s10, 4  ;;  %p1909_p0 = scmp.ge.s32.totalorder %s2945_s30, 1  ;;  %s3025_s11 = int_to_ptr.vmem [resolvable:$true] %s275_s11 }
   0x7   : > { %p249_p1 = scmp.lt.s32.totalorder %s2945_s30, 3  ;;  %p3364_p2 = scmp.eq.s32.totalorder %s3020_s12, 0 }
   0x8   : > { %s2948_s14 = smov [#allocation7]   ;;  %s2949_s16 = smov [#allocation10]  }
   0x9   : > { %p3027_p3 = pnand %p1909_p0, %p249_p1  ;;  %s299_s15 = sshll.u32 %s2948_s14, 4  ;;  %s3033_s15 = int_to_ptr.vmem [resolvable:$true] %s299_s15 }
   0xa   : > { %s323_s17 = sshll.u32 %s2949_s16, 4  ;;  %s2950_s19 = smov [#allocation2]   ;;  %s3041_s17 = int_to_ptr.vmem [resolvable:$true] %s323_s17 }
   0xb   : > { %s3366_s13 = scalar_select %p3027_p3, 1, 0 }
   0xc   : > { %p2629_p4 = pneg %p3027_p3  ;;  %s261_s20 = sshll.u32 %s2950_s19, 4  ;;  %s3043_s20 = int_to_ptr.vmem [resolvable:$true] %s261_s20 }
   0xd   : > { %s2695_s23 = scalar_lea.hbm %s3356_s2, 96 }
   0xe   : > { %p3037_p5 = pnand %p3364_p2, %p2629_p4  ;;  %p2696_p6 = scmp.ne.s32.totalorder %s3356_s2, %s2695_s23 }
   0xf   : > { %p2702_p10 = scmp.lt.u32.totalorder %s2695_s23, %s3356_s2 }
  0x10   : > { %p3053_p7 = pneg %p3037_p5 }
  0x12   : > { %p2698_p8 = pnand %p3053_p7, %p2696_p6 }
  0x14   : > { %p2699_p9 = pneg %p2698_p8 }
  0x16   : > { %p2704_p11 = pnand %p2702_p10, %p2699_p9 }
  0x18   : > { %2707 = shalt.err (!%p2704_p11)
}
  0x19   : > { %s2708_s29 = scalar_lea.vmem %s3025_s11, 96  ;;  %p2716_p1 = scmp.lt.s32.totalorder %s3025_s11, %s3025_s11 }
  0x1a   : > { %p2709_p12 = scmp.ne.s32.totalorder %s3025_s11, %s2708_s29  ;;  %p2717_p4 = scmp.lt.s32.totalorder %s2708_s29, %s2708_s29 }
  0x1c   : > { %p2711_p13 = pnand %p2709_p12, %p3053_p7  ;;  %p2718_p6 = por %p2717_p4, %p2716_p1 }
  0x1e   : > { %p2712_p0 = pneg %p2711_p13 }
  0x20   : > { %p2719_p8 = pnand %p2718_p6, %p2712_p0 }
  0x22   : > { %2722 = shalt.err (!%p2719_p8)
}
  0x23   : > { %2635 = dma.hbm_to_vmem [thread:$0]  (!%p3037_p5), %s3356_s2, 96, %s3025_s11, [#allocation5]  }
  0x24   : > { %s2723_s21 = scalar_lea.hbm %s3358_s4, 48 }
  0x25   : > { %p2724_p9 = scmp.ne.s32.totalorder %s3358_s4, %s2723_s21  ;;  %p2730_p12 = scmp.lt.u32.totalorder %s2723_s21, %s3358_s4 }
  0x27   : > { %p2726_p10 = pnand %p2724_p9, %p3053_p7 }
  0x29   : > { %p2727_p11 = pneg %p2726_p10 }
  0x2b   : > { %p2732_p13 = pnand %p2730_p12, %p2727_p11 }
  0x2d   : > { %2735 = shalt.err (!%p2732_p13)
}
  0x2e   : > { %s2736_s11 = scalar_lea.vmem %s3033_s15, 48  ;;  %s2743_s27 = scalar_lea.vmem %s3033_s15, 64 }
  0x2f   : > { %p2737_p0 = scmp.ne.s32.totalorder %s3033_s15, %s2736_s11  ;;  %p2744_p6 = scmp.lt.s32.totalorder %s3033_s15, %s3033_s15 }
  0x30   : > { %p2745_p8 = scmp.lt.s32.totalorder %s2743_s27, %s2736_s11 }
  0x31   : > { %p2739_p1 = pnand %p2737_p0, %p3053_p7 }
  0x32   : > { %p2746_p9 = por %p2745_p8, %p2744_p6 }
  0x33   : > { %p2740_p4 = pneg %p2739_p1 }
  0x35   : > { %p2747_p10 = pnand %p2746_p9, %p2740_p4 }
  0x37   : > { %2750 = shalt.err (!%p2747_p10)
}
  0x38   : > { %2641 = dma.hbm_to_vmem [thread:$0]  (!%p3037_p5), %s3358_s4, 48, %s3033_s15, [#allocation8]  }
  0x39   : > { %s2751_s16 = scalar_lea.hbm %s3360_s6, 16 }
  0x3a   : > { %p2752_p11 = scmp.ne.s32.totalorder %s3360_s6, %s2751_s16  ;;  %p2758_p0 = scmp.lt.u32.totalorder %s2751_s16, %s3360_s6 }
  0x3c   : > { %p2754_p12 = pnand %p2752_p11, %p3053_p7 }
  0x3e   : > { %p2755_p13 = pneg %p2754_p12 }
  0x40   : > { %p2760_p1 = pnand %p2758_p0, %p2755_p13 }
  0x42   : > { %2763 = shalt.err (!%p2760_p1)
}
  0x43   : > { %s2764_s15 = scalar_lea.vmem %s3041_s17, 16  ;;  %s2771_s24 = scalar_lea.vmem %s3041_s17, 32 }
  0x44   : > { %p2765_p4 = scmp.ne.s32.totalorder %s3041_s17, %s2764_s15  ;;  %p2772_p9 = scmp.lt.s32.totalorder %s3041_s17, %s3041_s17 }
  0x45   : > { %p2773_p10 = scmp.lt.s32.totalorder %s2771_s24, %s2764_s15 }
  0x46   : > { %p2767_p6 = pnand %p2765_p4, %p3053_p7 }
  0x47   : > { %p2774_p11 = por %p2773_p10, %p2772_p9 }
  0x48   : > { %p2768_p8 = pneg %p2767_p6 }
  0x4a   : > { %p2775_p12 = pnand %p2774_p11, %p2768_p8 }
  0x4c   : > { %2778 = shalt.err (!%p2775_p12)
}
  0x4d   : > { %2647 = dma.hbm_to_vmem [thread:$0]  (!%p3037_p5), %s3360_s6, 16, %s3041_s17, [#allocation11]  }
  0x4e   : > { %s2779_s29 = scalar_lea.hbm %s3355_s1, 5376 }
  0x4f   : > { %p2780_p13 = scmp.ne.s32.totalorder %s3355_s1, %s2779_s29  ;;  %p2786_p4 = scmp.lt.u32.totalorder %s2779_s29, %s3355_s1 }
  0x51   : > { %p2782_p0 = pnand %p2780_p13, %p3053_p7 }
  0x53   : > { %p2783_p1 = pneg %p2782_p0 }
  0x55   : > { %p2788_p6 = pnand %p2786_p4, %p2783_p1 }
  0x57   : > { %2791 = shalt.err (!%p2788_p6)
}
  0x58   : > { %s2792_s17 = scalar_lea.vmem %s3043_s20, 5376  ;;  %p2800_p11 = scmp.lt.s32.totalorder %s3043_s20, %s3043_s20 }
  0x59   : > { %p2793_p8 = scmp.ne.s32.totalorder %s3043_s20, %s2792_s17  ;;  %p2801_p12 = scmp.lt.s32.totalorder %s2792_s17, %s2792_s17 }
  0x5b   : > { %p2795_p9 = pnand %p2793_p8, %p3053_p7  ;;  %p2802_p13 = por %p2801_p12, %p2800_p11 }
  0x5d   : > { %p2796_p10 = pneg %p2795_p9 }
  0x5f   : > { %p2803_p0 = pnand %p2802_p13, %p2796_p10 }
  0x61   : > { %2806 = shalt.err (!%p2803_p0)
}
  0x62   : > { %s2951_s21 = smov 768   ;;  %s2952_s22 = smov 48  }
  0x63   : > { %2632 = dma.hbm_to_vmem [thread:$0]  (!%p3037_p5), %s3355_s1, 5376, %s3043_s20, [#allocation3], %s2951_s21, %s2951_s21, %s2952_s22  }
  0x64   : > { %s2953_s24 = smov [#allocation6]   ;;  %s2807_s28 = scalar_lea.hbm %s3357_s3, 36864 }
  0x65   : > { %s285_s25 = sshll.u32 %s2953_s24, 4  ;;  %p2808_p1 = scmp.ne.s32.totalorder %s3357_s3, %s2807_s28  ;;  %s286_s25 = int_to_ptr.vmem [resolvable:$true] %s285_s25 }
  0x66   : > { %p2814_p8 = scmp.lt.u32.totalorder %s2807_s28, %s3357_s3 }
  0x67   : > { %p2810_p4 = pnand %p2808_p1, %p3053_p7 }
  0x69   : > { %p2811_p6 = pneg %p2810_p4 }
  0x6b   : > { %p2816_p9 = pnand %p2814_p8, %p2811_p6 }
  0x6d   : > { %2819 = shalt.err (!%p2816_p9)
}
  0x6e   : > { %s2820_s20 = scalar_lea.vmem %s286_s25, 36864  ;;  %p2828_p13 = scmp.lt.s32.totalorder %s286_s25, %s286_s25 }
  0x6f   : > { %p2821_p10 = scmp.ne.s32.totalorder %s286_s25, %s2820_s20  ;;  %p2829_p0 = scmp.lt.s32.totalorder %s2820_s20, %s2820_s20 }
  0x71   : > { %p2823_p11 = pnand %p2821_p10, %p3053_p7  ;;  %p2830_p2 = por %p2829_p0, %p2828_p13 }
  0x73   : > { %p2824_p12 = pneg %p2823_p11 }
  0x75   : > { %p2831_p3 = pnand %p2830_p2, %p2824_p12 }
  0x77   : > { %2834 = shalt.err (!%p2831_p3)
}
  0x78   : > { %s2954_s19 = smov 384   ;;  %s2955_s17 = smov 24  }
  0x79   : > { %2638 = dma.hbm_to_vmem [thread:$0]  (!%p3037_p5), %s3357_s3, 36864, %s286_s25, [#allocation5], %s2954_s19, %s2954_s19, %s2955_s17  }
  0x7a   : > { %s2956_s23 = smov [#allocation9]   ;;  %s2835_s27 = scalar_lea.hbm %s3359_s5, 6144 }
  0x7b   : > { %s309_s15 = sshll.u32 %s2956_s23, 4  ;;  %p2836_p2 = scmp.ne.s32.totalorder %s3359_s5, %s2835_s27  ;;  %s310_s15 = int_to_ptr.vmem [resolvable:$true] %s309_s15 }
  0x7c   : > { %p2842_p4 = scmp.lt.u32.totalorder %s2835_s27, %s3359_s5 }
  0x7d   : > { %p2838_p3 = pnand %p2836_p2, %p3053_p7 }
  0x7f   : > { %p2839_p1 = pneg %p2838_p3 }
  0x81   : > { %p2844_p6 = pnand %p2842_p4, %p2839_p1 }
  0x83   : > { %2847 = shalt.err (!%p2844_p6)
}
  0x84   : > { %s2848_s25 = scalar_lea.vmem %s310_s15, 6144  ;;  %p2856_p11 = scmp.lt.s32.totalorder %s310_s15, %s310_s15 }
  0x85   : > { %p2849_p8 = scmp.ne.s32.totalorder %s310_s15, %s2848_s25  ;;  %p2857_p12 = scmp.lt.s32.totalorder %s2848_s25, %s2848_s25 }
  0x87   : > { %p2851_p9 = pnand %p2849_p8, %p3053_p7  ;;  %p2858_p13 = por %p2857_p12, %p2856_p11 }
  0x89   : > { %p2852_p10 = pneg %p2851_p9 }
  0x8b   : > { %p2859_p0 = pnand %p2858_p13, %p2852_p10 }
  0x8d   : > { %2862 = shalt.err (!%p2859_p0)
}
  0x8e   : > { %s2957_s16 = smov 128   ;;  %s2958_s20 = smov 8  }
  0x8f   : > { %2644 = dma.hbm_to_vmem [thread:$0]  (!%p3037_p5), %s3359_s5, 6144, %s310_s15, [#allocation8], %s2957_s16, %s2957_s16, %s2958_s20  }
  0x90   : > { %s2959_s21 = smov [#allocation12]   ;;  %s2960_s23 = smov [#allocation13]  }
  0x91   : > { %s333_s22 = sshll.u32 %s2959_s21, 4  ;;  %s347_s24 = sshll.u32 %s2960_s23, 4  ;;  %s334_s22 = int_to_ptr.vmem [resolvable:$true] %s333_s22  ;;  %s348_s24 = int_to_ptr.vmem [resolvable:$true] %s347_s24 }
  0x92   : > { %s2863_s28 = scalar_lea.hbm %s3361_s7, 2048 }
  0x93   : > { %p2864_p2 = scmp.ne.s32.totalorder %s3361_s7, %s2863_s28  ;;  %p2870_p4 = scmp.lt.u32.totalorder %s2863_s28, %s3361_s7 }
  0x95   : > { %p2866_p3 = pnand %p2864_p2, %p3053_p7 }
  0x97   : > { %p2867_p1 = pneg %p2866_p3 }
  0x99   : > { %p2872_p6 = pnand %p2870_p4, %p2867_p1 }
  0x9b   : > { %2875 = shalt.err (!%p2872_p6)
}
  0x9c   : > { %s2876_s15 = scalar_lea.vmem %s334_s22, 2048  ;;  %p2884_p11 = scmp.lt.s32.totalorder %s334_s22, %s334_s22 }
  0x9d   : > { %p2877_p8 = scmp.ne.s32.totalorder %s334_s22, %s2876_s15  ;;  %p2885_p12 = scmp.lt.s32.totalorder %s2876_s15, %s2876_s15 }
  0x9f   : > { %p2879_p9 = pnand %p2877_p8, %p3053_p7  ;;  %p2886_p13 = por %p2885_p12, %p2884_p11 }
  0xa1   : > { %p2880_p10 = pneg %p2879_p9 }
  0xa3   : > { %p2887_p0 = pnand %p2886_p13, %p2880_p10 }
  0xa5   : > { %2890 = shalt.err (!%p2887_p0)
}
  0xa6   : > { %2650 = dma.hbm_to_vmem [thread:$0]  (!%p3037_p5), %s3361_s7, 2048, %s334_s22, [#allocation11], %s2957_s16, %s2957_s16, %s2958_s20  }
  0xa7   : > { %s2891_s11 = scalar_lea.hbm %s3362_s8, 16 }
  0xa8   : > { %p2892_p2 = scmp.ne.s32.totalorder %s3362_s8, %s2891_s11  ;;  %p2898_p4 = scmp.lt.u32.totalorder %s2891_s11, %s3362_s8 }
  0xaa   : > { %p2894_p3 = pnand %p2892_p2, %p3053_p7 }
  0xac   : > { %p2895_p1 = pneg %p2894_p3 }
  0xae   : > { %p2900_p6 = pnand %p2898_p4, %p2895_p1 }
  0xb0   : > { %2903 = shalt.err (!%p2900_p6)
}
  0xb1   : > { %s2904_s14 = scalar_lea.vmem %s348_s24, 16  ;;  %s2911_s16 = scalar_lea.vmem %s348_s24, 32 }
  0xb2   : > { %p2905_p8 = scmp.ne.s32.totalorder %s348_s24, %s2904_s14  ;;  %p2912_p11 = scmp.lt.s32.totalorder %s348_s24, %s348_s24 }
  0xb3   : > { %p2913_p12 = scmp.lt.s32.totalorder %s2911_s16, %s2904_s14 }
  0xb4   : > { %p2907_p9 = pnand %p2905_p8, %p3053_p7 }
  0xb5   : > { %p2914_p13 = por %p2913_p12, %p2912_p11 }
  0xb6   : > { %p2908_p10 = pneg %p2907_p9 }
  0xb8   : > { %p2915_p0 = pnand %p2914_p13, %p2908_p10 }
  0xba   : > { %2918 = shalt.err (!%p2915_p0)
}
  0xbb   : > { %2653 = dma.hbm_to_vmem [thread:$0]  (!%p3037_p5), %s3362_s8, 16, %s348_s24, [#allocation14]  }
  0xbc   : > { %p3369_p2 = scmp.ne.s32.totalorder %s3366_s13, 0 }
  0xbd   : > { %p3370_p3 = scmp.eq.s32.totalorder (!%p3369_p2), %s3020_s12, 0 }
  0xbe   : > { %367 = sbr.rel (%p3369_p2) target bundleno = 1254 (0x4e6), region = 56 }
  0xc5   : > { %2924 = dma.done.wait (%p3370_p3), [#allocation3], 5376   ;;  %p3371_p7 = pmov %p3370_p3 }
  0xc6   : > { %p3372_p1 = pmov %p3370_p3 }
  0xc7   : > { %2926 = vsyncadd (%p3371_p7), [#allocation3], 4294961920 }
  0xc8   : > { %2928 = dma.done.wait (%p3372_p1), [#allocation5], 36960   ;;  %p3373_p4 = pmov %p3372_p1 }
  0xc9   : > { %p3374_p6 = pmov %p3372_p1 }
  0xca   : > { %2930 = vsyncadd (%p3373_p4), [#allocation5], 4294930336 }
  0xcb   : > { %2932 = dma.done.wait (%p3374_p6), [#allocation8], 6192   ;;  %p3375_p5 = pmov %p3372_p1 }
  0xcc   : > { %p3376_p8 = pmov %p3372_p1 }
  0xcd   : > { %2934 = vsyncadd (%p3375_p5), [#allocation8], 4294961104 }
  0xce   : > { %2936 = dma.done.wait (%p3376_p8), [#allocation11], 2064   ;;  %p3377_p9 = pmov %p3372_p1 }
  0xcf   : > { %p3378_p10 = pmov %p3372_p1 }
  0xd0   : > { %2938 = vsyncadd (%p3377_p9), [#allocation11], 4294965232 }
  0xd1   : > { %2940 = dma.done.wait (%p3378_p10), [#allocation14], 16   ;;  %p3379_p11 = pmov %p3372_p1 }
  0xd2   : > { %v2961_v0 = vmov 0.0   ;;  %v439_v1 = vld [vmem:[#allocation2 + $0x8] sm:$0xff]  ;;  %v445_v2 = vld [vmem:[#allocation2 + $0x38] sm:$0xff]  ;;  %v438_v3 = vld [vmem:[#allocation2] sm:$0xff]  ;;  %p429_p12 = scmp.lt.s32.totalorder %s3020_s12, 1  ;;  %vm516_vm0 = vcmask 1041408  }
  0xd3   : > { %2942 = vsyncadd (%p3379_p11), [#allocation14], 4294967280  ;;  %599 = vmatprep.mubr.f32.mxu0 %v2961_v0  ;;  %670 = vmatprep.mubr.f32.mxu1 %v2961_v0  ;;  %v2187_v4 = vpack.c.bf16 %v445_v2, %v439_v1  ;;  %v444_v5 = vld [vmem:[#allocation2 + $0x30] sm:$0xff]  ;;  %v451_v6 = vld [vmem:[#allocation2 + $0x68] sm:$0xff]  ;;  %vm512_vm1 = vcmask 408576   ;;  %vm2963_vm2 = vmmov 0  }
  0xd4   : > { %v457_v7 = vld [vmem:[#allocation2 + $0x98] sm:$0xff]  ;;  %v2189_v8 = vpack.c.bf16 %v444_v5, %v438_v3  ;;  %v450_v10 = vld [vmem:[#allocation2 + $0x60] sm:$0xff]  ;;  %v456_v11 = vld [vmem:[#allocation2 + $0x90] sm:$0xff]  ;;  %s3381_s12 = smov (!%p429_p12, %s3020_s12), 1 }
  0xd5   : > { %v2191_v9 = vpack.c.bf16 %v457_v7, %v451_v6  ;;  %v463_v12 = vld [vmem:[#allocation2 + $0xc8] sm:$0xff]  ;;  %2188 = vmatprep.subr.bf16.mxu0 %v2187_v4  ;;  %v469_v13 = vld [vmem:[#allocation2 + $0xf8] sm:$0xff]  ;;  %v2193_v14 = vpack.c.bf16 %v456_v11, %v450_v10  ;;  %v462_v15 = vld [vmem:[#allocation2 + $0xc0] sm:$0xff]  ;;  %s1928_s13 = sshll.u32 %s3381_s12, 3 }
  0xd6   : > { %2190 = vmatpush1.bf16.msra.mxu0 %v2189_v8  ;;  %v468_v16 = vld [vmem:[#allocation2 + $0xf0] sm:$0xff]  ;;  %v2195_v17 = vpack.c.bf16 %v469_v13, %v463_v12  ;;  %v441_v18 = vld [vmem:[#allocation2 + $0x18] sm:$0xff]  ;;  %v447_v19 = vld [vmem:[#allocation2 + $0x48] sm:$0xff]  ;;  %s432_s24 = scalar_lea.vmem %s3354_s0, %s1928_s13  ;;  %s436_s19 = scalar_lea.vmem %s3363_s9, %s1928_s13 }
  0xd7   : > { %2192 = vmatprep.subr.bf16.mxu0 %v2191_v9  ;;  %v440_v20 = vld [vmem:[#allocation2 + $0x10] sm:$0xff]  ;;  %v2199_v21 = vpack.c.bf16 %v447_v19, %v441_v18  ;;  %v446_v22 = vld [vmem:[#allocation2 + $0x40] sm:$0xff]  ;;  %v453_v23 = vld [vmem:[#allocation2 + $0x78] sm:$0xff]  ;;  %v2197_v30 = vpack.c.bf16 %v468_v16, %v462_v15 }
  0xd8   : > { %v459_v24 = vld [vmem:[#allocation2 + $0xa8] sm:$0xff]  ;;  %v2201_v25 = vpack.c.bf16 %v446_v22, %v440_v20  ;;  %v452_v27 = vld [vmem:[#allocation2 + $0x70] sm:$0xff]  ;;  %v458_v28 = vld [vmem:[#allocation2 + $0xa0] sm:$0xff] }
  0xd9   : > { %v2203_v26 = vpack.c.bf16 %v459_v24, %v453_v23  ;;  %v465_v29 = vld [vmem:[#allocation2 + $0xd8] sm:$0xff]  ;;  %2200 = vmatprep.subr.bf16.mxu1 %v2199_v21  ;;  %v471_v31 = vld [vmem:[#allocation2 + $0x108] sm:$0xff]  ;;  %v2205_v32 = vpack.c.bf16 %v458_v28, %v452_v27  ;;  %v464_v35 = vld [vmem:[#allocation2 + $0xd0] sm:$0xff] }
  0xda   : > { %2194 = vmatpush1.bf16.msra.mxu0 %v2193_v14  ;;  %2202 = vmatpush1.bf16.msra.mxu1 %v2201_v25  ;;  %v475_v33 = vld [vmem:[#allocation2 + $0x128] sm:$0x3]  ;;  %v2207_v34 = vpack.c.bf16 %v471_v31, %v465_v29  ;;  %v470_v36 = vld [vmem:[#allocation2 + $0x100] sm:$0xff]  ;;  %v449_v38 = vld [vmem:[#allocation2 + $0x58] sm:$0xff] }
  0xdb   : > { %2196 = vmatprep.subr.bf16.mxu0 %v2195_v17  ;;  %2204 = vmatprep.subr.bf16.mxu1 %v2203_v26  ;;  %v443_v37 = vld [vmem:[#allocation2 + $0x28] sm:$0xff]  ;;  %v442_v39 = vld [vmem:[#allocation2 + $0x20] sm:$0xff]  ;;  %v448_v40 = vld [vmem:[#allocation2 + $0x50] sm:$0xff]  ;;  %v2209_v42 = vpack.c.bf16 %v470_v36, %v464_v35 }
  0xdc   : > { %v474_v41 = vld [vmem:[#allocation2 + $0x120] sm:$0x3]  ;;  %v455_v43 = vld [vmem:[#allocation2 + $0x88] sm:$0xff]  ;;  %v461_v44 = vld [vmem:[#allocation2 + $0xb8] sm:$0xff]  ;;  %v2211_v47 = vpack.c.bf16 %v449_v38, %v443_v37  ;;  %v2213_v49 = vpack.c.bf16 %v448_v40, %v442_v39 }
  0xdd   : > { %v3254_v45 = vld [vmem:[%s432_s24] sm:$0xff]  ;;  %v477_v46 = vld [vmem:[#allocation2 + $0x138] sm:$0x3]  ;;  %v460_v50 = vld [vmem:[#allocation2 + $0xb0] sm:$0xff]  ;;  %v2215_v53 = vpack.c.bf16 %v461_v44, %v455_v43 }
  0xde   : > { %2198 = vmatpush1.bf16.msra.mxu0 %v2197_v30  ;;  %2206 = vmatpush1.bf16.msra.mxu1 %v2205_v32  ;;  %v454_v48 = vld [vmem:[#allocation2 + $0x80] sm:$0xff]  ;;  %v758_v52 = vld [vmem:[#allocation6 + $0x20] sm:$0xff]  ;;  %v467_v54 = vld [vmem:[#allocation2 + $0xe8] sm:$0xff] }
  0xdf   : > { %1930 = vmatprep.subr.msk.mxu0 %vm516_vm0, %v475_v33  ;;  %2208 = vmatprep.subr.bf16.mxu1 %v2207_v34  ;;  %v755_v51 = vld [vmem:[#allocation6 + $0x8] sm:$0xff]  ;;  %v754_v55 = vld [vmem:[#allocation6] sm:$0xff]  ;;  %v757_v56 = vld [vmem:[#allocation6 + $0x18] sm:$0xff]  ;;  %v2217_v62 = vpack.c.bf16 %v460_v50, %v454_v48 }
  0xe0   : > { %v473_v57 = vld [vmem:[#allocation2 + $0x118] sm:$0xff]  ;;  %v761_v58 = vld [vmem:[#allocation6 + $0x38] sm:$0xff]  ;;  %v764_v59 = vld [vmem:[#allocation6 + $0x50] sm:$0xff]  ;;  %v2223_v61 = vpack.c.bf16 %v758_v52, %v755_v51  ;;  %v2225_v1 = vpack.c.bf16 %v757_v56, %v754_v55 }
  0xe1   : > { %v476_v60 = vld [vmem:[#allocation2 + $0x130] sm:$0x3]  ;;  %v466_v63 = vld [vmem:[#allocation2 + $0xe0] sm:$0xff]  ;;  %v2219_v2 = vpack.c.bf16 %v473_v57, %v467_v54  ;;  %v2227_v4 = vpack.c.bf16 %v764_v59, %v761_v58  ;;  %v770_v8 = vld [vmem:[#allocation6 + $0x80] sm:$0xff] }
  0xe2   : > { %1931 = vmatpush1.msk.msra.mxu0 %vm516_vm0, %v474_v41  ;;  %2210 = vmatpush1.bf16.msra.mxu1 %v2209_v42  ;;  %v472_v3 = vld [vmem:[#allocation2 + $0x110] sm:$0xff]  ;;  %v760_v5 = vld [vmem:[#allocation6 + $0x30] sm:$0xff]  ;;  %v763_v6 = vld [vmem:[#allocation6 + $0x48] sm:$0xff] }
  0xe3   : > { %1932 = vmatmul.mubr.msk.f32.vlgmr.msra.gmra.mrb[0].mxu0 %vm512_vm1, %v3254_v45  ;;  %1933 = vmatprep.subr.msk.mxu1 %vm516_vm0, %v477_v46  ;;  %v767_v7 = vld [vmem:[#allocation6 + $0x68] sm:$0xff]  ;;  %v2221_v9 = vpack.c.bf16 %v472_v3, %v466_v63  ;;  %v2229_v10 = vpack.c.bf16 %v763_v6, %v760_v5  ;;  %v766_v12 = vld [vmem:[#allocation6 + $0x60] sm:$0xff]  ;;  %v769_v13 = vld [vmem:[#allocation6 + $0x78] sm:$0xff] }
  0xe4   : > { %2212 = vmatprep.subr.bf16.mxu0 %v2211_v47  ;;  %741 = vmatprep.mubr.f32.mxu0 %v2961_v0  ;;  %v2231_v11 = vpack.c.bf16 %v770_v8, %v767_v7  ;;  %v479_v14 = vld [vmem:[#allocation2 + $0x148] sm:$0x3]  ;;  %v773_v15 = vld [vmem:[#allocation6 + $0x98] sm:$0xff]  ;;  %v478_v17 = vld [vmem:[#allocation2 + $0x140] sm:$0x3]  ;;  %v2233_v20 = vpack.c.bf16 %v769_v13, %v766_v12 }
  0xe5   : > { %2214 = vmatpush1.bf16.msra.mxu0 %v2213_v49  ;;  %v776_v16 = vld [vmem:[#allocation6 + $0xb0] sm:$0xff]  ;;  %v807_v19 = vld [vmem:[#allocation6 + $0x1a8] sm:$0xff]  ;;  %v810_v26 = vld [vmem:[#allocation6 + $0x1c0] sm:$0xff] }
  0xe6   : > { %2216 = vmatprep.subr.bf16.mxu0 %v2215_v53  ;;  %1934 = vmatpush1.msk.msra.mxu1 %vm516_vm0, %v476_v60  ;;  %v804_v18 = vld [vmem:[#allocation6 + $0x190] sm:$0xff]  ;;  %v759_v23 = vld [vmem:[#allocation6 + $0x28] sm:$0xff]  ;;  %v2235_v24 = vpack.c.bf16 %v776_v16, %v773_v15  ;;  %v813_v27 = vld [vmem:[#allocation6 + $0x1d8] sm:$0xff] }
  0xe7   : > { %1935 = vmatmul.mubr.msk.f32.vlgmr.msra.gmra.mrb[0].mxu1 %vm512_vm1, %v3254_v45  ;;  %2224 = vmatprep.subr.bf16.mxu1 %v2223_v61  ;;  %v772_v21 = vld [vmem:[#allocation6 + $0x90] sm:$0xff]  ;;  %v775_v25 = vld [vmem:[#allocation6 + $0xa8] sm:$0xff]  ;;  %v782_v29 = vld [vmem:[#allocation6 + $0xe0] sm:$0xff]  ;;  %v2415_v30 = vpack.c.bf16 %v807_v19, %v804_v18  ;;  %v2419_v34 = vpack.c.bf16 %v813_v27, %v810_v26 }
  0xe8   : > { %2226 = vmatpush1.bf16.msra.mxu1 %v2225_v1  ;;  %v756_v22 = vld [vmem:[#allocation6 + $0x10] sm:$0xff]  ;;  %v779_v28 = vld [vmem:[#allocation6 + $0xc8] sm:$0xff]  ;;  %v2237_v32 = vpack.c.bf16 %v775_v25, %v772_v21  ;;  %v778_v33 = vld [vmem:[#allocation6 + $0xc0] sm:$0xff] }
  0xe9   : > { %2218 = vmatpush1.bf16.msra.mxu0 %v2217_v62  ;;  %2228 = vmatprep.subr.bf16.mxu1 %v2227_v4  ;;  %v2417_v31 = vpack.c.bf16 %v759_v23, %v756_v22  ;;  %v762_v35 = vld [vmem:[#allocation6 + $0x40] sm:$0xff]  ;;  %v765_v36 = vld [vmem:[#allocation6 + $0x58] sm:$0xff]  ;;  %v2239_v37 = vpack.c.bf16 %v782_v29, %v779_v28  ;;  %v816_v39 = vld [vmem:[#allocation6 + $0x1f0] sm:$0xff] }
  0xea   : > { %2220 = vmatprep.subr.bf16.mxu0 %v2219_v2  ;;  %v781_v38 = vld [vmem:[#allocation6 + $0xd8] sm:$0xff]  ;;  %v819_v40 = vld [vmem:[#allocation6 + $0x208] sm:$0xff]  ;;  %v788_v42 = vld [vmem:[#allocation6 + $0x110] sm:$0xff]  ;;  %v2421_v43 = vpack.c.bf16 %v765_v36, %v762_v35 }
  0xeb   : > { %v785_v41 = vld [vmem:[#allocation6 + $0xf8] sm:$0xff]  ;;  %v2241_v44 = vpack.c.bf16 %v781_v38, %v778_v33  ;;  %v784_v46 = vld [vmem:[#allocation6 + $0xf0] sm:$0xff]  ;;  %v2423_v47 = vpack.c.bf16 %v819_v40, %v816_v39  ;;  %v771_v49 = vld [vmem:[#allocation6 + $0x88] sm:$0xff] }
  0xec   : > { %2230 = vmatpush1.bf16.msra.mxu1 %v2229_v10  ;;  %v768_v48 = vld [vmem:[#allocation6 + $0x70] sm:$0xff]  ;;  %v2243_v50 = vpack.c.bf16 %v788_v42, %v785_v41  ;;  %v822_v51 = vld [vmem:[#allocation6 + $0x220] sm:$0xff]  ;;  %v825_v52 = vld [vmem:[#allocation6 + $0x238] sm:$0xff] }
  0xed   : > { %2222 = vmatpush1.bf16.msra.mxu0 %v2221_v9  ;;  %2232 = vmatprep.subr.bf16.mxu1 %v2231_v11  ;;  %v791_v53 = vld [vmem:[#allocation6 + $0x128] sm:$0xff]  ;;  %v794_v54 = vld [vmem:[#allocation6 + $0x140] sm:$0xff]  ;;  %v2425_v55 = vpack.c.bf16 %v771_v49, %v768_v48  ;;  %v2427_v58 = vpack.c.bf16 %v825_v52, %v822_v51  ;;  %v777_v60 = vld [vmem:[#allocation6 + $0xb8] sm:$0xff] }
  0xee   : > { %1936 = vmatprep.subr.msk.mxu0 %vm516_vm0, %v479_v14  ;;  %v790_v57 = vld [vmem:[#allocation6 + $0x120] sm:$0xff]  ;;  %v2247_v61 = vpack.c.bf16 %v794_v54, %v791_v53  ;;  %v793_v62 = vld [vmem:[#allocation6 + $0x138] sm:$0xff]  ;;  %v828_v63 = vld [vmem:[#allocation6 + $0x250] sm:$0xff] }
  0xef   : > { %v774_v59 = vld [vmem:[#allocation6 + $0xa0] sm:$0xff]  ;;  %v831_v1 = vld [vmem:[#allocation6 + $0x268] sm:$0xff]  ;;  %v797_v2 = vld [vmem:[#allocation6 + $0x158] sm:$0xff]  ;;  %v2249_v5 = vpack.c.bf16 %v793_v62, %v790_v57 }
  0xf0   : > { %2234 = vmatpush1.bf16.msra.mxu1 %v2233_v20  ;;  %v800_v3 = vld [vmem:[#allocation6 + $0x170] sm:$0xff]  ;;  %v2429_v4 = vpack.c.bf16 %v777_v60, %v774_v59  ;;  %v2431_v7 = vpack.c.bf16 %v831_v1, %v828_v63  ;;  %v783_v9 = vld [vmem:[#allocation6 + $0xe8] sm:$0xff]  ;;  %v834_v12 = vld [vmem:[#allocation6 + $0x280] sm:$0xff] }
  0xf1   : > { %1937 = vmatpush1.msk.msra.mxu0 %vm516_vm0, %v478_v17  ;;  %2236 = vmatprep.subr.bf16.mxu1 %v2235_v24  ;;  %v796_v6 = vld [vmem:[#allocation6 + $0x150] sm:$0xff]  ;;  %v2251_v10 = vpack.c.bf16 %v800_v3, %v797_v2  ;;  %v799_v11 = vld [vmem:[#allocation6 + $0x168] sm:$0xff]  ;;  %v837_v13 = vld [vmem:[#allocation6 + $0x298] sm:$0xff] }
  0xf2   : > { %1938 = vmatmul.mubr.msk.f32.vlgmr.msra.gmra.mrb[2].mxu0 %vm512_vm1, %v3254_v45  ;;  %2416 = vmatprep.subr.bf16.mxu0 %v2415_v30  ;;  %v787_v45 = vld [vmem:[#allocation6 + $0x108] sm:$0xff]  ;;  %v780_v8 = vld [vmem:[#allocation6 + $0xd0] sm:$0xff]  ;;  %v806_v15 = vld [vmem:[#allocation6 + $0x1a0] sm:$0xff]  ;;  %v2253_v17 = vpack.c.bf16 %v799_v11, %v796_v6  ;;  %v2435_v19 = vpack.c.bf16 %v837_v13, %v834_v12 }
  0xf3   : > { %2418 = vmatpush3.bf16.msra.mxu0 %v2417_v31  ;;  %v2245_v56 = vpack.c.bf16 %v787_v45, %v784_v46  ;;  %v803_v14 = vld [vmem:[#allocation6 + $0x188] sm:$0xff]  ;;  %v2433_v16 = vpack.c.bf16 %v783_v9, %v780_v8  ;;  %v802_v18 = vld [vmem:[#allocation6 + $0x180] sm:$0xff]  ;;  %v789_v21 = vld [vmem:[#allocation6 + $0x118] sm:$0xff] }
  0xf4   : > { %2238 = vmatpush1.bf16.msra.mxu1 %v2237_v32  ;;  %2420 = vmatprep.subr.bf16.mxu0 %v2419_v34  ;;  %v786_v20 = vld [vmem:[#allocation6 + $0x100] sm:$0xff]  ;;  %v2255_v22 = vpack.c.bf16 %v806_v15, %v803_v14  ;;  %v805_v23 = vld [vmem:[#allocation6 + $0x198] sm:$0xff]  ;;  %v840_v24 = vld [vmem:[#allocation6 + $0x2b0] sm:$0xff] }
  0xf5   : > { %2240 = vmatprep.subr.bf16.mxu1 %v2239_v37  ;;  %v843_v25 = vld [vmem:[#allocation6 + $0x2c8] sm:$0xff]  ;;  %v809_v26 = vld [vmem:[#allocation6 + $0x1b8] sm:$0xff]  ;;  %v812_v27 = vld [vmem:[#allocation6 + $0x1d0] sm:$0xff]  ;;  %v2437_v28 = vpack.c.bf16 %v789_v21, %v786_v20  ;;  %v2257_v29 = vpack.c.bf16 %v805_v23, %v802_v18  ;;  %v482_v23 = vlaneseq }
  0xf6   : > { %v2439_v30 = vpack.c.bf16 %v843_v25, %v840_v24  ;;  %v792_v31 = vld [vmem:[#allocation6 + $0x130] sm:$0xff]  ;;  %v795_v32 = vld [vmem:[#allocation6 + $0x148] sm:$0xff]  ;;  %v2259_v33 = vpack.c.bf16 %v812_v27, %v809_v26  ;;  %v818_v37 = vld [vmem:[#allocation6 + $0x200] sm:$0xff] }
  0xf7   : > { %2422 = vmatpush3.bf16.msra.mxu0 %v2421_v43  ;;  %v808_v34 = vld [vmem:[#allocation6 + $0x1b0] sm:$0xff]  ;;  %v811_v35 = vld [vmem:[#allocation6 + $0x1c8] sm:$0xff]  ;;  %v2441_v38 = vpack.c.bf16 %v795_v32, %v792_v31  ;;  %v814_v41 = vld [vmem:[#allocation6 + $0x1e0] sm:$0xff]  ;;  %v3268_v24 = vshrl.u32 %v482_v23, 7 }
  0xf8   : > { %2242 = vmatpush1.bf16.msra.mxu1 %v2241_v44  ;;  %2424 = vmatprep.subr.bf16.mxu0 %v2423_v47  ;;  %v815_v36 = vld [vmem:[#allocation6 + $0x1e8] sm:$0xff]  ;;  %v2261_v39 = vpack.c.bf16 %v811_v35, %v808_v34  ;;  %v817_v42 = vld [vmem:[#allocation6 + $0x1f8] sm:$0xff]  ;;  %v824_v44 = vld [vmem:[#allocation6 + $0x230] sm:$0xff] }
  0xf9   : > { %2244 = vmatprep.subr.bf16.mxu1 %v2243_v50  ;;  %v2263_v40 = vpack.c.bf16 %v818_v37, %v815_v36  ;;  %v821_v43 = vld [vmem:[#allocation6 + $0x218] sm:$0xff]  ;;  %v2265_v46 = vpack.c.bf16 %v817_v42, %v814_v41  ;;  %v820_v48 = vld [vmem:[#allocation6 + $0x210] sm:$0xff]  ;;  %v823_v49 = vld [vmem:[#allocation6 + $0x228] sm:$0xff]  ;;  %v484_v25 = vsub.s32 0, %v3268_v24  ;;  %v488_v27 = vsub.s32 1, %v3268_v24 }
  0xfa   : > { %v2267_v47 = vpack.c.bf16 %v824_v44, %v821_v43  ;;  %v827_v50 = vld [vmem:[#allocation6 + $0x248] sm:$0xff]  ;;  %v830_v45 = vld [vmem:[#allocation6 + $0x260] sm:$0xff]  ;;  %v2269_v51 = vpack.c.bf16 %v823_v49, %v820_v48  ;;  %v829_v54 = vld [vmem:[#allocation6 + $0x258] sm:$0xff] }
  0xfb   : > { %2426 = vmatpush3.bf16.msra.mxu0 %v2425_v55  ;;  %v2271_v52 = vpack.c.bf16 %v830_v45, %v827_v50  ;;  %v826_v53 = vld [vmem:[#allocation6 + $0x240] sm:$0xff]  ;;  %v833_v55 = vld [vmem:[#allocation6 + $0x278] sm:$0xff]  ;;  %v832_v59 = vld [vmem:[#allocation6 + $0x270] sm:$0xff] }
  0xfc   : > { %2246 = vmatpush1.bf16.msra.mxu1 %v2245_v56  ;;  %2428 = vmatprep.subr.bf16.mxu0 %v2427_v58  ;;  %v836_v56 = vld [vmem:[#allocation6 + $0x290] sm:$0xff]  ;;  %v2273_v57 = vpack.c.bf16 %v829_v54, %v826_v53  ;;  %v835_v60 = vld [vmem:[#allocation6 + $0x288] sm:$0xff]  ;;  %v842_v62 = vld [vmem:[#allocation6 + $0x2c0] sm:$0xff] }
  0xfd   : > { %2248 = vmatprep.subr.bf16.mxu1 %v2247_v61  ;;  %v2275_v58 = vpack.c.bf16 %v836_v56, %v833_v55  ;;  %v839_v61 = vld [vmem:[#allocation6 + $0x2a8] sm:$0xff]  ;;  %v2277_v63 = vpack.c.bf16 %v835_v60, %v832_v59  ;;  %v838_v2 = vld [vmem:[#allocation6 + $0x2a0] sm:$0xff]  ;;  %v841_v3 = vld [vmem:[#allocation6 + $0x2b8] sm:$0xff] }
  0xfe   : > { %v2279_v1 = vpack.c.bf16 %v842_v62, %v839_v61  ;;  %v848_v6 = vld [vmem:[#allocation6 + $0x2f0] sm:$0xff]  ;;  %v849_v9 = vld [vmem:[#allocation6 + $0x2f8] sm:$0xff]  ;;  %v847_v11 = vld [vmem:[#allocation6 + $0x2e8] sm:$0xff] }
  0xff   : > { %2430 = vmatpush3.bf16.msra.mxu0 %v2429_v4  ;;  %v2281_v4 = vpack.c.bf16 %v841_v3, %v838_v2  ;;  %v798_v14 = vld [vmem:[#allocation6 + $0x160] sm:$0xff]  ;;  %v801_v15 = vld [vmem:[#allocation6 + $0x178] sm:$0xff]  ;;  %v903_v21 = vld [vmem:[#allocation6 + $0x4a8] sm:$0xff] }
 0x100   : > { %2250 = vmatpush1.bf16.msra.mxu1 %v2249_v5  ;;  %2432 = vmatprep.subr.bf16.mxu0 %v2431_v7  ;;  %v845_v5 = vld [vmem:[#allocation6 + $0x2d8] sm:$0xff]  ;;  %v846_v7 = vld [vmem:[#allocation6 + $0x2e0] sm:$0xff]  ;;  %v852_v36 = vld [vmem:[#allocation6 + $0x310] sm:$0xff] }
 0x101   : > { %2252 = vmatprep.subr.bf16.mxu1 %v2251_v10  ;;  %v2283_v8 = vpack.c.bf16 %v848_v6, %v845_v5  ;;  %v844_v10 = vld [vmem:[#allocation6 + $0x2d0] sm:$0xff]  ;;  %v2443_v12 = vpack.c.bf16 %v849_v9, %v846_v7  ;;  %v854_v18 = vld [vmem:[#allocation6 + $0x320] sm:$0xff]  ;;  %v3271_v26 = vld [vmem:[#allocation4] sm:$0x3f] }
 0x102   : > { %v2285_v13 = vpack.c.bf16 %v847_v11, %v844_v10  ;;  %v850_v32 = vld [vmem:[#allocation6 + $0x300] sm:$0xff]  ;;  %v855_v37 = vld [vmem:[#allocation6 + $0x328] sm:$0xff]  ;;  %v909_v42 = vld [vmem:[#allocation6 + $0x4d8] sm:$0xff] }
 0x103   : > { %2434 = vmatpush3.bf16.msra.mxu0 %v2433_v16  ;;  %v2445_v16 = vpack.c.bf16 %v801_v15, %v798_v14  ;;  %v906_v41 = vld [vmem:[#allocation6 + $0x4c0] sm:$0xff]  ;;  %v856_v48 = vld [vmem:[#allocation6 + $0x330] sm:$0xff]  ;;  %v859_v49 = vld [vmem:[#allocation6 + $0x348] sm:$0xff] }
 0x104   : > { %2254 = vmatpush1.bf16.msra.mxu1 %v2253_v17  ;;  %2436 = vmatprep.subr.bf16.mxu0 %v2435_v19  ;;  %v851_v17 = vld [vmem:[#allocation6 + $0x308] sm:$0xff]  ;;  %v900_v19 = vld [vmem:[#allocation6 + $0x490] sm:$0xff]  ;;  %v861_v53 = vld [vmem:[#allocation6 + $0x358] sm:$0xff]  ;;  %v2293_v61 = vpack.c.bf16 %v859_v49, %v856_v48 }
 0x105   : > { %2256 = vmatprep.subr.bf16.mxu1 %v2255_v22  ;;  %v2287_v20 = vpack.c.bf16 %v854_v18, %v851_v17  ;;  %v2447_v22 = vpack.c.bf16 %v903_v21, %v900_v19  ;;  %v863_v54 = vld [vmem:[#allocation6 + $0x368] sm:$0xff]  ;;  %v866_v56 = vld [vmem:[#allocation6 + $0x380] sm:$0xff]  ;;  %v869_v6 = vld [vmem:[#allocation6 + $0x398] sm:$0xff] }
 0x106   : > { %v2295_v2 = vpack.c.bf16 %v866_v56, %v863_v54  ;;  %v867_v5 = vld [vmem:[#allocation6 + $0x388] sm:$0xff]  ;;  %v918_v9 = vld [vmem:[#allocation6 + $0x520] sm:$0xff]  ;;  %v921_v10 = vld [vmem:[#allocation6 + $0x538] sm:$0xff] }
 0x107   : > { %2438 = vmatpush3.bf16.msra.mxu0 %v2437_v28  ;;  %v485_v28 = vrot.slane %v3271_v26, %v484_v25  ;;  %v871_v14 = vld [vmem:[#allocation6 + $0x3a8] sm:$0xff]  ;;  %v870_v17 = vld [vmem:[#allocation6 + $0x3a0] sm:$0xff]  ;;  %v873_v18 = vld [vmem:[#allocation6 + $0x3b8] sm:$0xff] }
 0x108   : > { %2258 = vmatpush1.bf16.msra.mxu1 %v2257_v29  ;;  %2440 = vmatprep.subr.bf16.mxu0 %v2439_v30  ;;  %v489_v29 = vrot.slane %v3271_v26, %v488_v27  ;;  %v496_v30 = vsub.s32 3, %v3268_v24  ;;  %v875_v19 = vld [vmem:[#allocation6 + $0x3c8] sm:$0xff]  ;;  %v924_v21 = vld [vmem:[#allocation6 + $0x550] sm:$0xff]  ;;  %v882_v48 = vld [vmem:[#allocation6 + $0x400] sm:$0xff] }
 0x109   : > { %2260 = vmatprep.subr.bf16.mxu1 %v2259_v33  ;;  %v853_v33 = vld [vmem:[#allocation6 + $0x318] sm:$0xff] }
 0x10a   : > { %v497_v43 = vrot.slane %v3271_v26, %v496_v30  ;;  %v874_v30 = vld [vmem:[#allocation6 + $0x3c0] sm:$0xff]  ;;  %v885_v49 = vld [vmem:[#allocation6 + $0x418] sm:$0xff] }
 0x10b   : > { %2442 = vmatpush3.bf16.msra.mxu0 %v2441_v38  ;;  %v857_v38 = vld [vmem:[#allocation6 + $0x338] sm:$0xff]  ;;  %v2469_v56 = vpack.c.bf16 %v885_v49, %v882_v48  ;;  %v911_v48 = vld [vmem:[#allocation6 + $0x4e8] sm:$0xff]  ;;  %v914_v49 = vld [vmem:[#allocation6 + $0x500] sm:$0xff] }
 0x10c   : > { %2262 = vmatpush1.bf16.msra.mxu1 %v2261_v39  ;;  %2444 = vmatprep.subr.bf16.mxu0 %v2443_v12 }
 0x10d   : > { %2264 = vmatprep.subr.bf16.mxu1 %v2263_v40  ;;  %v860_v40 = vld [vmem:[#allocation6 + $0x350] sm:$0xff] }
 0x10e   : > { %v2291_v45 = vpack.c.bf16 %v860_v40, %v857_v38  ;;  %v884_v38 = vld [vmem:[#allocation6 + $0x410] sm:$0xff]  ;;  %v933_v40 = vld [vmem:[#allocation6 + $0x598] sm:$0xff] }
 0x10f   : > { %2446 = vmatpush3.bf16.msra.mxu0 %v2445_v16  ;;  %v2459_v16 = vpack.c.bf16 %v921_v10, %v918_v9  ;;  %v895_v9 = vld [vmem:[#allocation6 + $0x468] sm:$0xff] }
 0x110   : > { %2266 = vmatpush1.bf16.msra.mxu1 %v2265_v46  ;;  %2448 = vmatprep.subr.bf16.mxu0 %v2447_v22  ;;  %v2289_v46 = vpack.c.bf16 %v853_v33, %v850_v32  ;;  %v927_v22 = vld [vmem:[#allocation6 + $0x568] sm:$0xff] }
 0x111   : > { %2268 = vmatprep.subr.bf16.mxu1 %v2267_v47  ;;  %v2449_v47 = vpack.c.bf16 %v855_v37, %v852_v36  ;;  %v879_v36 = vld [vmem:[#allocation6 + $0x3e8] sm:$0xff]  ;;  %v881_v37 = vld [vmem:[#allocation6 + $0x3f8] sm:$0xff] }
 0x114   : > { %2270 = vmatpush1.bf16.msra.mxu1 %v2269_v51  ;;  %v2451_v51 = vpack.c.bf16 %v909_v42, %v906_v41 }
 0x115   : > { %2272 = vmatprep.subr.bf16.mxu1 %v2271_v52  ;;  %v858_v52 = vld [vmem:[#allocation6 + $0x340] sm:$0xff] }
 0x116   : > { %v2453_v62 = vpack.c.bf16 %v861_v53, %v858_v52  ;;  %v939_v52 = vld [vmem:[#allocation6 + $0x5c8] sm:$0xff]  ;;  %v492_v53 = vsub.s32 2, %v3268_v24 }
 0x118   : > { %2274 = vmatpush1.bf16.msra.mxu1 %v2273_v57  ;;  %v912_v57 = vld [vmem:[#allocation6 + $0x4f0] sm:$0xff] }
 0x119   : > { %2276 = vmatprep.subr.bf16.mxu1 %v2275_v58  ;;  %v915_v58 = vld [vmem:[#allocation6 + $0x508] sm:$0xff] }
 0x11a   : > { %v2455_v3 = vpack.c.bf16 %v915_v58, %v912_v57  ;;  %v886_v57 = vld [vmem:[#allocation6 + $0x420] sm:$0xff]  ;;  %v889_v58 = vld [vmem:[#allocation6 + $0x438] sm:$0xff] }
 0x11c   : > { %2278 = vmatpush1.bf16.msra.mxu1 %v2277_v63  ;;  %v862_v63 = vld [vmem:[#allocation6 + $0x360] sm:$0xff] }
 0x11d   : > { %2280 = vmatprep.subr.bf16.mxu1 %v2279_v1  ;;  %v865_v1 = vld [vmem:[#allocation6 + $0x378] sm:$0xff] }
 0x11e   : > { %v2297_v11 = vpack.c.bf16 %v865_v1, %v862_v63  ;;  %v893_v63 = vld [vmem:[#allocation6 + $0x458] sm:$0xff]  ;;  %v896_v1 = vld [vmem:[#allocation6 + $0x470] sm:$0xff] }
 0x11f   : > { %v2315_v10 = vpack.c.bf16 %v896_v1, %v893_v63  ;;  %v1014_v63 = vld [vmem:[#allocation6 + $0x820] sm:$0xff]  ;;  %v1017_v1 = vld [vmem:[#allocation6 + $0x838] sm:$0xff] }
 0x120   : > { %2282 = vmatpush1.bf16.msra.mxu1 %v2281_v4  ;;  %v864_v4 = vld [vmem:[#allocation6 + $0x370] sm:$0xff] }
 0x121   : > { %2284 = vmatprep.subr.bf16.mxu1 %v2283_v8  ;;  %v872_v8 = vld [vmem:[#allocation6 + $0x3b0] sm:$0xff]  ;;  %v2457_v12 = vpack.c.bf16 %v867_v5, %v864_v4  ;;  %v504_v4 = vsub.s32 5, %v3268_v24  ;;  %v493_v5 = vrot.slane %v3271_v26, %v492_v53 }
 0x122   : > { %v2299_v15 = vpack.c.bf16 %v872_v8, %v869_v6  ;;  %v2313_v6 = vpack.c.bf16 %v889_v58, %v886_v57  ;;  %v892_v8 = vld [vmem:[#allocation6 + $0x450] sm:$0xff]  ;;  %v2327_v57 = vpack.c.bf16 %v914_v49, %v911_v48 }
 0x124   : > { %2286 = vmatpush1.bf16.msra.mxu1 %v2285_v13  ;;  %v868_v13 = vld [vmem:[#allocation6 + $0x390] sm:$0xff] }
 0x125   : > { %2288 = vmatprep.subr.bf16.mxu1 %v2287_v20  ;;  %v878_v20 = vld [vmem:[#allocation6 + $0x3e0] sm:$0xff] }
 0x126   : > { %v2303_v33 = vpack.c.bf16 %v878_v20, %v875_v19  ;;  %v2317_v20 = vpack.c.bf16 %v895_v9, %v892_v8  ;;  %v966_v8 = vld [vmem:[#allocation6 + $0x6a0] sm:$0xff]  ;;  %v969_v9 = vld [vmem:[#allocation6 + $0x6b8] sm:$0xff] }
 0x1b6   : > { %v601_v31 = vpop.f32.mrb[0].mxu0 }
 0x1b7   : > { %v602_v34 = vadd.f32 %v601_v31, %v485_v28  ;;  %v603_v35 = vpop.f32.mrb[1].mxu0  ;;  %v2301_v28 = vpack.c.bf16 %v871_v14, %v868_v13  ;;  %v877_v31 = vld [vmem:[#allocation6 + $0x3d8] sm:$0xff]  ;;  %v899_v14 = vld [vmem:[#allocation6 + $0x488] sm:$0xff] }
 0x1b8   : > { %v604_v39 = vadd.f32 %v603_v35, %v489_v29  ;;  %v2461_v29 = vpack.c.bf16 %v873_v18, %v870_v17  ;;  %v876_v35 = vld [vmem:[#allocation6 + $0x3d0] sm:$0xff]  ;;  %v2305_v41 = vpack.c.bf16 %v877_v31, %v874_v30  ;;  %v897_v13 = vld [vmem:[#allocation6 + $0x478] sm:$0xff]  ;;  %v999_v17 = vld [vmem:[#allocation6 + $0x7a8] sm:$0xff]  ;;  %v505_v18 = vrot.slane %v3271_v26, %v504_v4 }
 0x1b9   : > { %v748_v50 = vmax.f32 %v602_v34, 0.0  ;;  %v2463_v34 = vpack.c.bf16 %v927_v22, %v924_v21  ;;  %v2465_v42 = vpack.c.bf16 %v879_v36, %v876_v35  ;;  %v898_v22 = vld [vmem:[#allocation6 + $0x480] sm:$0xff]  ;;  %v948_v31 = vld [vmem:[#allocation6 + $0x610] sm:$0xff] }
 0x1ba   : > { %v749_v44 = vmax.f32 %v604_v39, 0.0  ;;  %v3282_v55 = vpop.f32.mrb[0].mxu1  ;;  %v930_v39 = vld [vmem:[#allocation6 + $0x580] sm:$0xff]  ;;  %v908_v35 = vld [vmem:[#allocation6 + $0x4d0] sm:$0xff] }
 0x1bb   : > { %v674_v59 = vpop.f32.mrb[1].mxu1  ;;  %v3295_v19 = vadd.f32 %v3282_v55, %v493_v5  ;;  %v1002_v36 = vld [vmem:[#allocation6 + $0x7c0] sm:$0xff]  ;;  %v916_v4 = vld [vmem:[#allocation6 + $0x510] sm:$0xff]  ;;  %v919_v5 = vld [vmem:[#allocation6 + $0x528] sm:$0xff] }
 0x1bc   : > { %1123 = vmatprep.mubr.f32.mxu1 %v749_v44  ;;  %1336 = vmatprep.mubr.f32.mxu0 %v749_v44  ;;  %v675_v60 = vadd.f32 %v674_v59, %v497_v43  ;;  %v880_v43 = vld [vmem:[#allocation6 + $0x3f0] sm:$0xff]  ;;  %v883_v44 = vld [vmem:[#allocation6 + $0x408] sm:$0xff] }
 0x1bd   : > { %1124 = vmatmul.mubr.f32.vlgmr.msra.gmra.mrb[2].mxu1 %v748_v50  ;;  %1337 = vmatmul.mubr.f32.vlgmr.msra.gmra.mrb[4].mxu0 %v748_v50  ;;  %v887_v50 = vld [vmem:[#allocation6 + $0x428] sm:$0xff]  ;;  %v2309_v54 = vpack.c.bf16 %v883_v44, %v880_v43  ;;  %v750_v55 = vmax.f32 %v3295_v19, 0.0  ;;  %v964_v19 = vld [vmem:[#allocation6 + $0x690] sm:$0xff] }
 0x1be   : > { %2290 = vmatpush1.bf16.msra.mxu1 %v2289_v46  ;;  %2450 = vmatpush3.bf16.msra.mxu0 %v2449_v47  ;;  %v751_v7 = vmax.f32 %v675_v60, 0.0  ;;  %v2307_v46 = vpack.c.bf16 %v884_v38, %v881_v37  ;;  %v2467_v47 = vpack.c.bf16 %v933_v40, %v930_v39  ;;  %v1005_v37 = vld [vmem:[#allocation6 + $0x7d8] sm:$0xff] }
 0x1bf   : > { %2292 = vmatprep.subr.bf16.mxu1 %v2291_v45  ;;  %2452 = vmatprep.subr.bf16.mxu0 %v2451_v51  ;;  %v890_v45 = vld [vmem:[#allocation6 + $0x440] sm:$0xff]  ;;  %v936_v51 = vld [vmem:[#allocation6 + $0x5b0] sm:$0xff]  ;;  %v2483_v44 = vpack.c.bf16 %v1005_v37, %v1002_v36  ;;  %v931_v36 = vld [vmem:[#allocation6 + $0x588] sm:$0xff] }
 0x1c0   : > { %1406 = vmatprep.mubr.f32.mxu0 %v751_v7  ;;  %1194 = vmatprep.mubr.f32.mxu1 %v751_v7  ;;  %v2311_v59 = vpack.c.bf16 %v890_v45, %v887_v50  ;;  %v2471_v60 = vpack.c.bf16 %v939_v52, %v936_v51  ;;  %v1008_v50 = vld [vmem:[#allocation6 + $0x7f0] sm:$0xff]  ;;  %v1011_v45 = vld [vmem:[#allocation6 + $0x808] sm:$0xff] }
 0x1c1   : > { %v2487_v58 = vpack.c.bf16 %v1011_v45, %v1008_v50  ;;  %v934_v50 = vld [vmem:[#allocation6 + $0x5a0] sm:$0xff]  ;;  %v937_v45 = vld [vmem:[#allocation6 + $0x5b8] sm:$0xff] }
 0x1c2   : > { %2294 = vmatpush1.bf16.msra.mxu1 %v2293_v61  ;;  %2454 = vmatpush3.bf16.msra.mxu0 %v2453_v62  ;;  %v888_v61 = vld [vmem:[#allocation6 + $0x430] sm:$0xff]  ;;  %v891_v62 = vld [vmem:[#allocation6 + $0x448] sm:$0xff] }
 0x1c3   : > { %2296 = vmatprep.subr.bf16.mxu1 %v2295_v2  ;;  %2456 = vmatprep.subr.bf16.mxu0 %v2455_v3  ;;  %v942_v2 = vld [vmem:[#allocation6 + $0x5e0] sm:$0xff]  ;;  %v945_v3 = vld [vmem:[#allocation6 + $0x5f8] sm:$0xff]  ;;  %v2473_v7 = vpack.c.bf16 %v891_v62, %v888_v61  ;;  %v920_v62 = vld [vmem:[#allocation6 + $0x530] sm:$0xff] }
 0x1c4   : > { %v917_v61 = vld [vmem:[#allocation6 + $0x518] sm:$0xff] }
 0x1c5   : > { %v3284_v23 = vpop.f32.mrb[2].mxu0 }
 0x1c6   : > { %2298 = vmatpush1.bf16.msra.mxu1 %v2297_v11  ;;  %2458 = vmatpush3.bf16.msra.mxu0 %v2457_v12  ;;  %v3286_v32 = vpop.f32.mrb[3].mxu0  ;;  %v2475_v11 = vpack.c.bf16 %v945_v3, %v942_v2  ;;  %v894_v12 = vld [vmem:[#allocation6 + $0x460] sm:$0xff] }
 0x1c7   : > { %2300 = vmatprep.subr.bf16.mxu1 %v2299_v15  ;;  %2460 = vmatprep.subr.bf16.mxu0 %v2459_v16  ;;  %v902_v15 = vld [vmem:[#allocation6 + $0x4a0] sm:$0xff]  ;;  %v996_v16 = vld [vmem:[#allocation6 + $0x790] sm:$0xff]  ;;  %v2477_v21 = vpack.c.bf16 %v897_v13, %v894_v12  ;;  %v3298_v38 = vadd.f32 %v3286_v32, %v505_v18  ;;  %v1023_v13 = vld [vmem:[#allocation6 + $0x868] sm:$0xff] }
 0x1c8   : > { %v2479_v30 = vpack.c.bf16 %v999_v17, %v996_v16  ;;  %v1020_v12 = vld [vmem:[#allocation6 + $0x850] sm:$0xff]  ;;  %v922_v16 = vld [vmem:[#allocation6 + $0x540] sm:$0xff]  ;;  %v925_v17 = vld [vmem:[#allocation6 + $0x558] sm:$0xff] }
 0x1c9   : > { %v753_v32 = vmax.f32 %v3298_v38, 0.0  ;;  %v970_v38 = vld [vmem:[#allocation6 + $0x6c0] sm:$0xff] }
 0x1ca   : > { %2302 = vmatpush1.bf16.msra.mxu1 %v2301_v28  ;;  %2462 = vmatpush3.bf16.msra.mxu0 %v2461_v29  ;;  %v901_v28 = vld [vmem:[#allocation6 + $0x498] sm:$0xff]  ;;  %v2319_v29 = vpack.c.bf16 %v902_v15, %v899_v14  ;;  %v2333_v14 = vpack.c.bf16 %v919_v5, %v916_v4  ;;  %v2493_v15 = vpack.c.bf16 %v969_v9, %v966_v8  ;;  %v943_v4 = vld [vmem:[#allocation6 + $0x5e8] sm:$0xff]  ;;  %v990_v5 = vld [vmem:[#allocation6 + $0x760] sm:$0xff] }
 0x1cb   : > { %2304 = vmatprep.subr.bf16.mxu1 %v2303_v33  ;;  %2464 = vmatprep.subr.bf16.mxu0 %v2463_v34  ;;  %v951_v33 = vld [vmem:[#allocation6 + $0x628] sm:$0xff]  ;;  %v905_v34 = vld [vmem:[#allocation6 + $0x4b8] sm:$0xff]  ;;  %v2321_v39 = vpack.c.bf16 %v901_v28, %v898_v22  ;;  %v950_v8 = vld [vmem:[#allocation6 + $0x620] sm:$0xff] }
 0x1cc   : > { %v2481_v40 = vpack.c.bf16 %v951_v33, %v948_v31  ;;  %v2323_v43 = vpack.c.bf16 %v908_v35, %v905_v34  ;;  %v975_v22 = vld [vmem:[#allocation6 + $0x6e8] sm:$0xff]  ;;  %v929_v28 = vld [vmem:[#allocation6 + $0x578] sm:$0xff]  ;;  %v2337_v33 = vpack.c.bf16 %v925_v17, %v922_v16  ;;  %v928_v35 = vld [vmem:[#allocation6 + $0x570] sm:$0xff] }
 0x1cd   : > { %v1029_v31 = vld [vmem:[#allocation6 + $0x898] sm:$0xff]  ;;  %v2341_v48 = vpack.c.bf16 %v931_v36, %v928_v35 }
 0x1ce   : > { %2306 = vmatpush1.bf16.msra.mxu1 %v2305_v41  ;;  %2466 = vmatpush3.bf16.msra.mxu0 %v2465_v42  ;;  %v904_v41 = vld [vmem:[#allocation6 + $0x4b0] sm:$0xff]  ;;  %v907_v42 = vld [vmem:[#allocation6 + $0x4c8] sm:$0xff] }
 0x1cf   : > { %2308 = vmatprep.subr.bf16.mxu1 %v2307_v46  ;;  %2468 = vmatprep.subr.bf16.mxu0 %v2467_v47  ;;  %v954_v46 = vld [vmem:[#allocation6 + $0x640] sm:$0xff]  ;;  %v957_v47 = vld [vmem:[#allocation6 + $0x658] sm:$0xff]  ;;  %v2325_v51 = vpack.c.bf16 %v907_v42, %v904_v41  ;;  %v935_v42 = vld [vmem:[#allocation6 + $0x5a8] sm:$0xff] }
 0x1d0   : > { %v2485_v52 = vpack.c.bf16 %v957_v47, %v954_v46  ;;  %v981_v41 = vld [vmem:[#allocation6 + $0x718] sm:$0xff]  ;;  %v1035_v46 = vld [vmem:[#allocation6 + $0x8c8] sm:$0xff]  ;;  %v500_v47 = vsub.s32 4, %v3268_v24 }
 0x1d1   : > { %v1521_v24 = vld [vmem:[#allocation9 + $0x120] sm:$0xff] }
 0x1d2   : > { %2310 = vmatpush1.bf16.msra.mxu1 %v2309_v54  ;;  %2470 = vmatpush3.bf16.msra.mxu0 %v2469_v56  ;;  %v910_v54 = vld [vmem:[#allocation6 + $0x4e0] sm:$0xff]  ;;  %v913_v56 = vld [vmem:[#allocation6 + $0x4f8] sm:$0xff] }
 0x1d3   : > { %2312 = vmatprep.subr.bf16.mxu1 %v2311_v59  ;;  %2472 = vmatprep.subr.bf16.mxu0 %v2471_v60  ;;  %v960_v59 = vld [vmem:[#allocation6 + $0x670] sm:$0xff]  ;;  %v963_v60 = vld [vmem:[#allocation6 + $0x688] sm:$0xff]  ;;  %v2329_v2 = vpack.c.bf16 %v913_v56, %v910_v54 }
 0x1d4   : > { %v2489_v3 = vpack.c.bf16 %v963_v60, %v960_v59  ;;  %v984_v54 = vld [vmem:[#allocation6 + $0x730] sm:$0xff]  ;;  %v987_v56 = vld [vmem:[#allocation6 + $0x748] sm:$0xff]  ;;  %v1038_v59 = vld [vmem:[#allocation6 + $0x8e0] sm:$0xff] }
 0x1d5   : > { %v1041_v60 = vld [vmem:[#allocation6 + $0x8f8] sm:$0xff] }
 0x1d6   : > { %2314 = vmatpush1.bf16.msra.mxu1 %v2313_v6  ;;  %2474 = vmatpush3.bf16.msra.mxu0 %v2473_v7  ;;  %v2331_v6 = vpack.c.bf16 %v920_v62, %v917_v61  ;;  %v2491_v7 = vpack.c.bf16 %v1017_v1, %v1014_v63  ;;  %v501_v61 = vrot.slane %v3271_v26, %v500_v47  ;;  %v940_v1 = vld [vmem:[#allocation6 + $0x5d0] sm:$0xff] }
 0x1d7   : > { %2316 = vmatprep.subr.bf16.mxu1 %v2315_v10  ;;  %2476 = vmatprep.subr.bf16.mxu0 %v2475_v11  ;;  %v923_v10 = vld [vmem:[#allocation6 + $0x548] sm:$0xff]  ;;  %v926_v11 = vld [vmem:[#allocation6 + $0x560] sm:$0xff]  ;;  %v2345_v62 = vpack.c.bf16 %v937_v45, %v934_v50  ;;  %v2505_v63 = vpack.c.bf16 %v987_v56, %v984_v54  ;;  %v2349_v26 = vpack.c.bf16 %v943_v4, %v940_v1  ;;  %v976_v47 = vld [vmem:[#allocation6 + $0x6f0] sm:$0xff] }
 0x1d8   : > { %v2335_v18 = vpack.c.bf16 %v926_v11, %v923_v10  ;;  %v3309_v9 = vadd.f32 %v3284_v23, %v501_v61  ;;  %v952_v23 = vld [vmem:[#allocation6 + $0x630] sm:$0xff]  ;;  %v986_v50 = vld [vmem:[#allocation6 + $0x740] sm:$0xff]  ;;  %v985_v54 = vld [vmem:[#allocation6 + $0x738] sm:$0xff] }
 0x1d9   : > { %v989_v56 = vld [vmem:[#allocation6 + $0x758] sm:$0xff]  ;;  %v991_v61 = vld [vmem:[#allocation6 + $0x768] sm:$0xff] }
 0x1da   : > { %2318 = vmatpush1.bf16.msra.mxu1 %v2317_v20  ;;  %2478 = vmatpush3.bf16.msra.mxu0 %v2477_v21  ;;  %v2495_v20 = vpack.c.bf16 %v1023_v13, %v1020_v12  ;;  %v972_v21 = vld [vmem:[#allocation6 + $0x6d0] sm:$0xff]  ;;  %v946_v12 = vld [vmem:[#allocation6 + $0x600] sm:$0xff]  ;;  %v949_v13 = vld [vmem:[#allocation6 + $0x618] sm:$0xff]  ;;  %v752_v16 = vmax.f32 %v3309_v9, 0.0 }
 0x1db   : > { %2320 = vmatprep.subr.bf16.mxu1 %v2319_v29  ;;  %2480 = vmatprep.subr.bf16.mxu0 %v2479_v30  ;;  %v932_v29 = vld [vmem:[#allocation6 + $0x590] sm:$0xff]  ;;  %v1026_v30 = vld [vmem:[#allocation6 + $0x880] sm:$0xff]  ;;  %v2497_v34 = vpack.c.bf16 %v975_v22, %v972_v21  ;;  %v2353_v17 = vpack.c.bf16 %v949_v13, %v946_v12  ;;  %v959_v21 = vld [vmem:[#allocation6 + $0x668] sm:$0xff] }
 0x1dc   : > { %v2339_v37 = vpack.c.bf16 %v932_v29, %v929_v28  ;;  %v962_v22 = vld [vmem:[#allocation6 + $0x680] sm:$0xff]  ;;  %v997_v4 = vld [vmem:[#allocation6 + $0x798] sm:$0xff] }
 0x1dd   : > { %1407 = vmatmul.mubr.f32.vlgmr.msra.gmra.mrb[6].mxu0 %v750_v55  ;;  %v2359_v29 = vpack.c.bf16 %v962_v22, %v959_v21  ;;  %v1010_v12 = vld [vmem:[#allocation6 + $0x800] sm:$0xff]  ;;  %v1012_v22 = vld [vmem:[#allocation6 + $0x810] sm:$0xff] }
 0x1de   : > { %2322 = vmatpush1.bf16.msra.mxu1 %v2321_v39  ;;  %2482 = vmatpush3.bf16.msra.mxu0 %v2481_v40  ;;  %v2499_v39 = vpack.c.bf16 %v1029_v31, %v1026_v30  ;;  %v978_v40 = vld [vmem:[#allocation6 + $0x700] sm:$0xff]  ;;  %v961_v31 = vld [vmem:[#allocation6 + $0x678] sm:$0xff] }
 0x1df   : > { %2324 = vmatprep.subr.bf16.mxu1 %v2323_v43  ;;  %2484 = vmatprep.subr.bf16.mxu0 %v2483_v44  ;;  %v938_v43 = vld [vmem:[#allocation6 + $0x5c0] sm:$0xff]  ;;  %v1032_v44 = vld [vmem:[#allocation6 + $0x8b0] sm:$0xff]  ;;  %v2501_v49 = vpack.c.bf16 %v981_v41, %v978_v40 }
 0x1e0   : > { %1476 = vmatprep.mubr.f32.mxu0 %v753_v32  ;;  %v958_v30 = vld [vmem:[#allocation6 + $0x660] sm:$0xff] }
 0x1e1   : > { %v2361_v35 = vpack.c.bf16 %v961_v31, %v958_v30  ;;  %v1022_v30 = vld [vmem:[#allocation6 + $0x860] sm:$0xff] }
 0x1e2   : > { %2326 = vmatpush1.bf16.msra.mxu1 %v2325_v51  ;;  %2486 = vmatpush3.bf16.msra.mxu0 %v2485_v52  ;;  %v2343_v51 = vpack.c.bf16 %v938_v43, %v935_v42  ;;  %v2503_v52 = vpack.c.bf16 %v1035_v46, %v1032_v44  ;;  %v977_v42 = vld [vmem:[#allocation6 + $0x6f8] sm:$0xff]  ;;  %v980_v43 = vld [vmem:[#allocation6 + $0x710] sm:$0xff]  ;;  %v1489_v9 = vld [vmem:[#allocation9 + $0x20] sm:$0xff] }
 0x1e3   : > { %2328 = vmatprep.subr.bf16.mxu1 %v2327_v57  ;;  %2488 = vmatprep.subr.bf16.mxu0 %v2487_v58  ;;  %v941_v57 = vld [vmem:[#allocation6 + $0x5d8] sm:$0xff]  ;;  %v944_v58 = vld [vmem:[#allocation6 + $0x5f0] sm:$0xff]  ;;  %v2371_v46 = vpack.c.bf16 %v980_v43, %v977_v42  ;;  %v1030_v43 = vld [vmem:[#allocation6 + $0x8a0] sm:$0xff] }
 0x1e6   : > { %2330 = vmatpush1.bf16.msra.mxu1 %v2329_v2  ;;  %2490 = vmatpush3.bf16.msra.mxu0 %v2489_v3  ;;  %v2347_v2 = vpack.c.bf16 %v944_v58, %v941_v57  ;;  %v2507_v3 = vpack.c.bf16 %v1041_v60, %v1038_v59  ;;  %v992_v57 = vld [vmem:[#allocation6 + $0x770] sm:$0xff] }
 0x1e7   : > { %2332 = vmatprep.subr.bf16.mxu1 %v2331_v6  ;;  %2492 = vmatprep.subr.bf16.mxu0 %v2491_v7  ;;  %v993_v6 = vld [vmem:[#allocation6 + $0x778] sm:$0xff]  ;;  %v947_v7 = vld [vmem:[#allocation6 + $0x608] sm:$0xff]  ;;  %v2379_v59 = vpack.c.bf16 %v992_v57, %v989_v56  ;;  %v988_v60 = vld [vmem:[#allocation6 + $0x750] sm:$0xff] }
 0x1e8   : > { %v2509_v10 = vpack.c.bf16 %v993_v6, %v990_v5  ;;  %v2351_v11 = vpack.c.bf16 %v950_v8, %v947_v7  ;;  %v2381_v1 = vpack.c.bf16 %v991_v61, %v988_v60  ;;  %v1001_v5 = vld [vmem:[#allocation6 + $0x7b8] sm:$0xff]  ;;  %v1004_v6 = vld [vmem:[#allocation6 + $0x7d0] sm:$0xff]  ;;  %v1485_v56 = vld [vmem:[#allocation9] sm:$0xff] }
 0x1e9   : > { %v2387_v8 = vpack.c.bf16 %v1004_v6, %v1001_v5  ;;  %v1504_v60 = vld [vmem:[#allocation9 + $0x98] sm:$0xff]  ;;  %v1507_v6 = vld [vmem:[#allocation9 + $0xb0] sm:$0xff] }
 0x1ea   : > { %2334 = vmatpush1.bf16.msra.mxu1 %v2333_v14  ;;  %2494 = vmatpush3.bf16.msra.mxu0 %v2493_v15  ;;  %v953_v14 = vld [vmem:[#allocation6 + $0x638] sm:$0xff]  ;;  %v956_v15 = vld [vmem:[#allocation6 + $0x650] sm:$0xff] }
 0x1eb   : > { %2336 = vmatprep.subr.bf16.mxu1 %v2335_v18  ;;  %2496 = vmatprep.subr.bf16.mxu0 %v2495_v20  ;;  %v2355_v18 = vpack.c.bf16 %v956_v15, %v953_v14  ;;  %v955_v20 = vld [vmem:[#allocation6 + $0x648] sm:$0xff]  ;;  %v1006_v15 = vld [vmem:[#allocation6 + $0x7e0] sm:$0xff] }
 0x1ec   : > { %v2357_v28 = vpack.c.bf16 %v955_v20, %v952_v23  ;;  %v1016_v23 = vld [vmem:[#allocation6 + $0x830] sm:$0xff] }
 0x1ee   : > { %2338 = vmatpush1.bf16.msra.mxu1 %v2337_v33  ;;  %2498 = vmatpush3.bf16.msra.mxu0 %v2497_v34  ;;  %v965_v33 = vld [vmem:[#allocation6 + $0x698] sm:$0xff]  ;;  %v968_v34 = vld [vmem:[#allocation6 + $0x6b0] sm:$0xff] }
 0x1ef   : > { %2340 = vmatprep.subr.bf16.mxu1 %v2339_v37  ;;  %2500 = vmatprep.subr.bf16.mxu0 %v2499_v39  ;;  %v2363_v36 = vpack.c.bf16 %v968_v34, %v965_v33  ;;  %v971_v37 = vld [vmem:[#allocation6 + $0x6c8] sm:$0xff]  ;;  %v974_v39 = vld [vmem:[#allocation6 + $0x6e0] sm:$0xff] }
 0x1f0   : > { %v2367_v41 = vpack.c.bf16 %v974_v39, %v971_v37  ;;  %v1018_v34 = vld [vmem:[#allocation6 + $0x840] sm:$0xff]  ;;  %v1024_v39 = vld [vmem:[#allocation6 + $0x870] sm:$0xff] }
 0x1f2   : > { %2342 = vmatpush1.bf16.msra.mxu1 %v2341_v48  ;;  %2502 = vmatpush3.bf16.msra.mxu0 %v2501_v49  ;;  %v979_v48 = vld [vmem:[#allocation6 + $0x708] sm:$0xff] }
 0x1f3   : > { %2344 = vmatprep.subr.bf16.mxu1 %v2343_v51  ;;  %2504 = vmatprep.subr.bf16.mxu0 %v2503_v52  ;;  %v983_v49 = vld [vmem:[#allocation6 + $0x728] sm:$0xff]  ;;  %v2373_v45 = vpack.c.bf16 %v979_v48, %v976_v47  ;;  %v982_v52 = vld [vmem:[#allocation6 + $0x720] sm:$0xff]  ;;  %v1040_v47 = vld [vmem:[#allocation6 + $0x8f0] sm:$0xff] }
 0x1f4   : > { %v2375_v51 = vpack.c.bf16 %v986_v50, %v983_v49  ;;  %v2377_v58 = vpack.c.bf16 %v985_v54, %v982_v52  ;;  %v1036_v50 = vld [vmem:[#allocation6 + $0x8d0] sm:$0xff]  ;;  %v1501_v52 = vld [vmem:[#allocation9 + $0x80] sm:$0xff] }
 0x1f5   : > { %v1502_v54 = vld [vmem:[#allocation9 + $0x88] sm:$0xff] }
 0x1f6   : > { %2346 = vmatpush1.bf16.msra.mxu1 %v2345_v62  ;;  %2506 = vmatpush3.bf16.msra.mxu0 %v2505_v63  ;;  %v995_v62 = vld [vmem:[#allocation6 + $0x788] sm:$0xff]  ;;  %v998_v63 = vld [vmem:[#allocation6 + $0x7a0] sm:$0xff]  ;;  %v2511_v57 = vpack.c.bf16 %v1502_v54, %v1501_v52 }
 0x1f7   : > { %2348 = vmatprep.subr.bf16.mxu1 %v2347_v2  ;;  %2508 = vmatprep.subr.bf16.mxu0 %v2507_v3  ;;  %v2383_v2 = vpack.c.bf16 %v998_v63, %v995_v62  ;;  %v994_v3 = vld [vmem:[#allocation6 + $0x780] sm:$0xff]  ;;  %v1487_v63 = vld [vmem:[#allocation9 + $0x10] sm:$0xff] }
 0x1f8   : > { %v2385_v7 = vpack.c.bf16 %v997_v4, %v994_v3  ;;  %v1506_v3 = vld [vmem:[#allocation9 + $0xa8] sm:$0xff] }
 0x1fa   : > { %2350 = vmatpush1.bf16.msra.mxu1 %v2349_v26  ;;  %2510 = vmatpush3.bf16.msra.mxu0 %v2509_v10  ;;  %v1000_v26 = vld [vmem:[#allocation6 + $0x7b0] sm:$0xff]  ;;  %v1003_v10 = vld [vmem:[#allocation6 + $0x7c8] sm:$0xff] }
 0x1fb   : > { %2352 = vmatprep.subr.bf16.mxu1 %v2351_v11  ;;  %v1007_v11 = vld [vmem:[#allocation6 + $0x7e8] sm:$0xff]  ;;  %v2389_v13 = vpack.c.bf16 %v1003_v10, %v1000_v26  ;;  %2512 = vmatprep.subr.bf16.mxu0 %v2511_v57  ;;  %v1491_v10 = vld [vmem:[#allocation9 + $0x30] sm:$0xff] }
 0x1fc   : > { %v2391_v14 = vpack.c.bf16 %v1010_v12, %v1007_v11  ;;  %v1492_v11 = vld [vmem:[#allocation9 + $0x38] sm:$0xff]  ;;  %v1509_v12 = vld [vmem:[#allocation9 + $0xc0] sm:$0xff] }
 0x1fd   : > { %1195 = vmatmul.mubr.f32.vlgmr.msra.gmra.mrb[2].mxu1 %v750_v55  ;;  %1477 = vmatmul.mubr.f32.vlgmr.msra.gmra.mrb[8].mxu0 %v752_v16  ;;  %v967_v55 = vld [vmem:[#allocation6 + $0x6a8] sm:$0xff] }
 0x1fe   : > { %2354 = vmatpush1.bf16.msra.mxu1 %v2353_v17  ;;  %1265 = vmatprep.mubr.f32.mxu1 %v753_v32  ;;  %v2365_v40 = vpack.c.bf16 %v967_v55, %v964_v19  ;;  %v973_v32 = vld [vmem:[#allocation6 + $0x6d8] sm:$0xff]  ;;  %v1028_v19 = vld [vmem:[#allocation6 + $0x890] sm:$0xff] }
 0x1ff   : > { %2356 = vmatprep.subr.bf16.mxu1 %v2355_v18  ;;  %v2369_v44 = vpack.c.bf16 %v973_v32, %v970_v38  ;;  %v1009_v17 = vld [vmem:[#allocation6 + $0x7f8] sm:$0xff]  ;;  %v1034_v38 = vld [vmem:[#allocation6 + $0x8c0] sm:$0xff] }
 0x200   : > { %v1013_v18 = vld [vmem:[#allocation6 + $0x818] sm:$0xff]  ;;  %v2393_v20 = vpack.c.bf16 %v1009_v17, %v1006_v15  ;;  %v1493_v17 = vld [vmem:[#allocation9 + $0x40] sm:$0xff] }
 0x201   : > { %v2395_v21 = vpack.c.bf16 %v1016_v23, %v1013_v18  ;;  %v1494_v18 = vld [vmem:[#allocation9 + $0x48] sm:$0xff]  ;;  %v1511_v23 = vld [vmem:[#allocation9 + $0xd0] sm:$0xff] }
 0x202   : > { %2358 = vmatpush1.bf16.msra.mxu1 %v2357_v28  ;;  %v1015_v28 = vld [vmem:[#allocation6 + $0x828] sm:$0xff] }
 0x203   : > { %2360 = vmatprep.subr.bf16.mxu1 %v2359_v29  ;;  %v1019_v29 = vld [vmem:[#allocation6 + $0x848] sm:$0xff]  ;;  %v2397_v31 = vpack.c.bf16 %v1015_v28, %v1012_v22  ;;  %v1495_v28 = vld [vmem:[#allocation9 + $0x50] sm:$0xff] }
 0x204   : > { %v2399_v33 = vpack.c.bf16 %v1022_v30, %v1019_v29  ;;  %v1496_v29 = vld [vmem:[#allocation9 + $0x58] sm:$0xff]  ;;  %v1513_v30 = vld [vmem:[#allocation9 + $0xe0] sm:$0xff] }
 0x206   : > { %2362 = vmatpush1.bf16.msra.mxu1 %v2361_v35  ;;  %v1021_v35 = vld [vmem:[#allocation6 + $0x858] sm:$0xff] }
 0x207   : > { %2364 = vmatprep.subr.bf16.mxu1 %v2363_v36  ;;  %v1025_v36 = vld [vmem:[#allocation6 + $0x878] sm:$0xff]  ;;  %v2401_v55 = vpack.c.bf16 %v1021_v35, %v1018_v34  ;;  %v1497_v35 = vld [vmem:[#allocation9 + $0x60] sm:$0xff] }
 0x208   : > { %v2403_v37 = vpack.c.bf16 %v1028_v19, %v1025_v36  ;;  %v1498_v36 = vld [vmem:[#allocation9 + $0x68] sm:$0xff] }
 0x209   : > { %v2537_v19 = vpack.c.bf16 %v1498_v36, %v1497_v35  ;;  %v1685_v35 = vld [vmem:[#allocation12 + $0x20] sm:$0xff]  ;;  %v1686_v36 = vld [vmem:[#allocation12 + $0x28] sm:$0xff] }
 0x20a   : > { %2366 = vmatpush1.bf16.msra.mxu1 %v2365_v40  ;;  %v1027_v40 = vld [vmem:[#allocation6 + $0x888] sm:$0xff] }
 0x20b   : > { %2368 = vmatprep.subr.bf16.mxu1 %v2367_v41  ;;  %v1031_v41 = vld [vmem:[#allocation6 + $0x8a8] sm:$0xff]  ;;  %v2405_v32 = vpack.c.bf16 %v1027_v40, %v1024_v39 }
 0x20c   : > { %v2407_v42 = vpack.c.bf16 %v1034_v38, %v1031_v41  ;;  %v1499_v41 = vld [vmem:[#allocation9 + $0x70] sm:$0xff]  ;;  %v1500_v38 = vld [vmem:[#allocation9 + $0x78] sm:$0xff] }
 0x20e   : > { %2370 = vmatpush1.bf16.msra.mxu1 %v2369_v44  ;;  %v1033_v44 = vld [vmem:[#allocation6 + $0x8b8] sm:$0xff] }
 0x20f   : > { %2372 = vmatprep.subr.bf16.mxu1 %v2371_v46  ;;  %v1037_v46 = vld [vmem:[#allocation6 + $0x8d8] sm:$0xff]  ;;  %v2409_v48 = vpack.c.bf16 %v1033_v44, %v1030_v43  ;;  %v2962_v44 = vmov 0.0|0.0  }
 0x210   : > { %v2411_v49 = vpack.c.bf16 %v1040_v47, %v1037_v46  ;;  %v1042_v46 = vld [vmem:[#allocation7] sm:$0x7] }
 0x211   : > { %v1055_v47 = vrot.slane %v1042_v46, %v492_v53  ;;  %v1518_v53 = vld [vmem:[#allocation9 + $0x108] sm:$0xff] }
 0x212   : > { %2374 = vmatpush1.bf16.msra.mxu1 %v2373_v45  ;;  %v1039_v45 = vld [vmem:[#allocation6 + $0x8e8] sm:$0xff] }
 0x213   : > { %2376 = vmatprep.subr.bf16.mxu1 %v2375_v51  ;;  %v2413_v51 = vpack.c.bf16 %v1039_v45, %v1036_v50 }
 0x216   : > { %2378 = vmatpush1.bf16.msra.mxu1 %v2377_v58  ;;  %v1486_v58 = vld [vmem:[#allocation9 + $0x8] sm:$0xff] }
 0x217   : > { %2380 = vmatprep.subr.bf16.mxu1 %v2379_v59  ;;  %v1503_v59 = vld [vmem:[#allocation9 + $0x90] sm:$0xff]  ;;  %v2513_v61 = vpack.c.bf16 %v1486_v58, %v1485_v56  ;;  %v1047_v58 = vrot.slane %v1042_v46, %v484_v25  ;;  %v1522_v25 = vld [vmem:[#allocation9 + $0x128] sm:$0xff] }
 0x218   : > { %v2515_v62 = vpack.c.bf16 %v1504_v60, %v1503_v59  ;;  %v1051_v59 = vrot.slane %v1042_v46, %v488_v27  ;;  %v2550_v27 = vpack.c.bf16 %v1522_v25, %v1521_v24  ;;  %v1694_v46 = vld [vmem:[#allocation12 + $0x68] sm:$0xff] }
 0x219   : > { %2514 = vmatpush3.bf16.msra.mxu0 %v2513_v61 }
 0x21a   : > { %2382 = vmatpush1.bf16.msra.mxu1 %v2381_v1  ;;  %v1488_v1 = vld [vmem:[#allocation9 + $0x18] sm:$0xff]  ;;  %2516 = vmatprep.subr.bf16.mxu0 %v2515_v62 }
 0x21b   : > { %2384 = vmatprep.subr.bf16.mxu1 %v2383_v2  ;;  %v1505_v2 = vld [vmem:[#allocation9 + $0xa0] sm:$0xff]  ;;  %v2517_v4 = vpack.c.bf16 %v1488_v1, %v1487_v63 }
 0x21c   : > { %v2519_v5 = vpack.c.bf16 %v1506_v3, %v1505_v2  ;;  %v1517_v63 = vld [vmem:[#allocation9 + $0x100] sm:$0xff] }
 0x21d   : > { %2518 = vmatpush3.bf16.msra.mxu0 %v2517_v4  ;;  %v2544_v3 = vpack.c.bf16 %v1518_v53, %v1517_v63 }
 0x21e   : > { %2386 = vmatpush1.bf16.msra.mxu1 %v2385_v7  ;;  %v1508_v7 = vld [vmem:[#allocation9 + $0xb8] sm:$0xff]  ;;  %2520 = vmatprep.subr.bf16.mxu0 %v2519_v5  ;;  %v1519_v5 = vld [vmem:[#allocation9 + $0x110] sm:$0xff] }
 0x21f   : > { %2388 = vmatprep.subr.bf16.mxu1 %v2387_v8  ;;  %v2523_v26 = vpack.c.bf16 %v1508_v7, %v1507_v6  ;;  %v1523_v6 = vld [vmem:[#allocation9 + $0x130] sm:$0xff]  ;;  %v1524_v7 = vld [vmem:[#allocation9 + $0x138] sm:$0xff] }
 0x222   : > { %2390 = vmatpush1.bf16.msra.mxu1 %v2389_v13  ;;  %v1510_v13 = vld [vmem:[#allocation9 + $0xc8] sm:$0xff] }
 0x223   : > { %2392 = vmatprep.subr.bf16.mxu1 %v2391_v14  ;;  %v2525_v14 = vpack.c.bf16 %v1492_v11, %v1491_v10  ;;  %v2527_v15 = vpack.c.bf16 %v1510_v13, %v1509_v12  ;;  %v1526_v10 = vld [vmem:[#allocation9 + $0x148] sm:$0xff]  ;;  %v1527_v12 = vld [vmem:[#allocation9 + $0x150] sm:$0xff]  ;;  %v1528_v13 = vld [vmem:[#allocation9 + $0x158] sm:$0xff] }
 0x226   : > { %2394 = vmatpush1.bf16.msra.mxu1 %v2393_v20  ;;  %v1512_v20 = vld [vmem:[#allocation9 + $0xd8] sm:$0xff] }
 0x227   : > { %2396 = vmatprep.subr.bf16.mxu1 %v2395_v21  ;;  %v2529_v21 = vpack.c.bf16 %v1494_v18, %v1493_v17  ;;  %v2531_v22 = vpack.c.bf16 %v1512_v20, %v1511_v23  ;;  %v1530_v17 = vld [vmem:[#allocation9 + $0x168] sm:$0xff]  ;;  %v1531_v23 = vld [vmem:[#allocation9 + $0x170] sm:$0xff]  ;;  %v1532_v20 = vld [vmem:[#allocation9 + $0x178] sm:$0xff] }
 0x22a   : > { %2398 = vmatpush1.bf16.msra.mxu1 %v2397_v31  ;;  %v1514_v31 = vld [vmem:[#allocation9 + $0xe8] sm:$0xff] }
 0x22b   : > { %2400 = vmatprep.subr.bf16.mxu1 %v2399_v33  ;;  %v2533_v33 = vpack.c.bf16 %v1496_v29, %v1495_v28  ;;  %v2535_v34 = vpack.c.bf16 %v1514_v31, %v1513_v30  ;;  %v1681_v28 = vld [vmem:[#allocation12] sm:$0xff]  ;;  %v1682_v29 = vld [vmem:[#allocation12 + $0x8] sm:$0xff]  ;;  %v1683_v30 = vld [vmem:[#allocation12 + $0x10] sm:$0xff] }
 0x22c   : > { %v2568_v31 = vpack.c.bf16 %v1682_v29, %v1681_v28 }
 0x22e   : > { %2402 = vmatpush1.bf16.msra.mxu1 %v2401_v55  ;;  %v1515_v55 = vld [vmem:[#allocation9 + $0xf0] sm:$0xff] }
 0x22f   : > { %2404 = vmatprep.subr.bf16.mxu1 %v2403_v37  ;;  %v1516_v37 = vld [vmem:[#allocation9 + $0xf8] sm:$0xff] }
 0x230   : > { %v2539_v40 = vpack.c.bf16 %v1516_v37, %v1515_v55  ;;  %v1687_v55 = vld [vmem:[#allocation12 + $0x30] sm:$0xff]  ;;  %v1688_v37 = vld [vmem:[#allocation12 + $0x38] sm:$0xff] }
 0x232   : > { %2406 = vmatpush1.bf16.msra.mxu1 %v2405_v32 }
 0x233   : > { %2408 = vmatprep.subr.bf16.mxu1 %v2407_v42  ;;  %v2541_v42 = vpack.c.bf16 %v1500_v38, %v1499_v41  ;;  %v1691_v38 = vld [vmem:[#allocation12 + $0x50] sm:$0xff] }
 0x236   : > { %2410 = vmatpush1.bf16.msra.mxu1 %v2409_v48 }
 0x237   : > { %2412 = vmatprep.subr.bf16.mxu1 %v2411_v49 }
 0x23a   : > { %2414 = vmatpush1.bf16.msra.mxu1 %v2413_v51 }
 0x23d   : > { %1266 = vmatmul.mubr.f32.vlgmr.msra.gmra.mrb[2].mxu1 %v752_v16  ;;  %v1490_v16 = vld [vmem:[#allocation9 + $0x28] sm:$0xff] }
 0x23e   : > { %v2521_v8 = vpack.c.bf16 %v1490_v16, %v1489_v9  ;;  %v1520_v9 = vld [vmem:[#allocation9 + $0x118] sm:$0xff] }
 0x23f   : > { %v2547_v16 = vpack.c.bf16 %v1520_v9, %v1519_v5 }
 0x240   : > { %2522 = vmatpush3.bf16.msra.mxu0 %v2521_v8  ;;  %v2553_v8 = vpack.c.bf16 %v1524_v7, %v1523_v6 }
 0x241   : > { %2524 = vmatprep.subr.bf16.mxu0 %v2523_v26  ;;  %v1525_v26 = vld [vmem:[#allocation9 + $0x140] sm:$0xff] }
 0x242   : > { %v2556_v11 = vpack.c.bf16 %v1526_v10, %v1525_v26 }
 0x244   : > { %2526 = vmatpush3.bf16.msra.mxu0 %v2525_v14  ;;  %v2559_v14 = vpack.c.bf16 %v1528_v13, %v1527_v12 }
 0x245   : > { %2528 = vmatprep.subr.bf16.mxu0 %v2527_v15  ;;  %v1529_v15 = vld [vmem:[#allocation9 + $0x160] sm:$0xff] }
 0x246   : > { %v2562_v18 = vpack.c.bf16 %v1530_v17, %v1529_v15 }
 0x248   : > { %2530 = vmatpush3.bf16.msra.mxu0 %v2529_v21  ;;  %v2565_v21 = vpack.c.bf16 %v1532_v20, %v1531_v23 }
 0x249   : > { %2532 = vmatprep.subr.bf16.mxu0 %v2531_v22 }
 0x24c   : > { %2534 = vmatpush3.bf16.msra.mxu0 %v2533_v33  ;;  %v1684_v33 = vld [vmem:[#allocation12 + $0x18] sm:$0xff] }
 0x24d   : > { %2536 = vmatprep.subr.bf16.mxu0 %v2535_v34  ;;  %v2571_v34 = vpack.c.bf16 %v1684_v33, %v1683_v30 }
 0x250   : > { %2538 = vmatpush3.bf16.msra.mxu0 %v2537_v19  ;;  %v2574_v19 = vpack.c.bf16 %v1686_v36, %v1685_v35 }
 0x251   : > { %2540 = vmatprep.subr.bf16.mxu0 %v2539_v40  ;;  %v1690_v40 = vld [vmem:[#allocation12 + $0x48] sm:$0xff] }
 0x254   : > { %2542 = vmatpush3.bf16.msra.mxu0 %v2541_v42 }
 0x255   : > { %2543 = vmatprep.subr.bf16.mxu0 %v2962_v44 }
 0x290   : > { %v1975_v39 = vpop.f32.mrb[4].mxu0 }
 0x291   : > { %v1976_v32 = vpop.f32.mrb[5].mxu0 }
 0x292   : > { %v1977_v43 = vadd.f32 %v1976_v32, %v1975_v39  ;;  %v2577_v39 = vpack.c.bf16 %v1688_v37, %v1687_v55  ;;  %v1692_v32 = vld [vmem:[#allocation12 + $0x58] sm:$0xff] }
 0x293   : > { %v2583_v42 = vpack.c.bf16 %v1692_v32, %v1691_v38 }
 0x294   : > { %v1339_v50 = vadd.f32 %v1977_v43, %v1055_v47  ;;  %v1693_v43 = vld [vmem:[#allocation12 + $0x60] sm:$0xff] }
 0x295   : > { %v2586_v47 = vpack.c.bf16 %v1694_v46, %v1693_v43 }
 0x2b0   : > { %v2010_v48 = vpop.f32.mrb[6].mxu0 }
 0x2b1   : > { %v2011_v49 = vpop.f32.mrb[7].mxu0 }
 0x2b2   : > { %v2012_v45 = vadd.f32 %v2011_v49, %v2010_v48  ;;  %v1695_v48 = vld [vmem:[#allocation12 + $0x70] sm:$0xff]  ;;  %v1696_v49 = vld [vmem:[#allocation12 + $0x78] sm:$0xff] }
 0x2b4   : > { %v1409_v51 = vadd.f32 %v2012_v45, %v1339_v50  ;;  %v2589_v50 = vpack.c.bf16 %v1696_v49, %v1695_v48 }
 0x2d0   : > { %v2045_v52 = vpop.f32.mrb[8].mxu0 }
 0x2d1   : > { %v2046_v54 = vpop.f32.mrb[9].mxu0 }
 0x2d2   : > { %v2047_v56 = vadd.f32 %v2046_v54, %v2045_v52  ;;  %v1939_v54 = vld [vmem:[#allocation10] ss:$0 sm:$0xff] }
 0x2d4   : > { %v1479_v57 = vadd.f32 %v2047_v56, %v1409_v51 }
 0x2d6   : > { %v1484_v22 = vmax.f32 %v1479_v57, 0.0 }
 0x310   : > { %v1267_v60 = vpop.f32.mrb[2].mxu1 }
 0x311   : > { %v2591_v61 = vadd.f32 %v1267_v60, %v1047_v58  ;;  %v1269_v62 = vpop.f32.mrb[3].mxu1 }
 0x312   : > { %v2592_v1 = vadd.f32 %v1269_v62, %v1051_v59 }
 0x313   : > { %v1482_v4 = vmax.f32 %v2591_v61, 0.0  ;;  %v1940_v61 = vld [vmem:[#allocation13] ss:$0 sm:$0xff] }
 0x314   : > { %v1483_v2 = vmax.f32 %v2592_v1, 0.0 }
 0x316   : > { %1604 = vmatprep.mubr.f32.mxu0 %v1483_v2 }
 0x317   : > { %1605 = vmatmul.mubr.f32.vlgmr.msra.gmra.mrb[10].mxu0 %v1482_v4 }
 0x318   : > { %2545 = vmatpush3.bf16.msra.mxu0 %v2544_v3  ;;  %2149 = vmatprep.mubr.msk.f32.mxu0 %vm2963_vm2, %v2961_v0 }
 0x319   : > { %2546 = vmatprep.subr.bf16.mxu0 %v2962_v44 }
 0x31c   : > { %2548 = vmatpush3.bf16.msra.mxu0 %v2547_v16 }
 0x31d   : > { %2549 = vmatprep.subr.bf16.mxu0 %v2962_v44 }
 0x320   : > { %2551 = vmatpush3.bf16.msra.mxu0 %v2550_v27 }
 0x321   : > { %2552 = vmatprep.subr.bf16.mxu0 %v2962_v44 }
 0x324   : > { %2554 = vmatpush3.bf16.msra.mxu0 %v2553_v8 }
 0x325   : > { %2555 = vmatprep.subr.bf16.mxu0 %v2962_v44 }
 0x328   : > { %2557 = vmatpush3.bf16.msra.mxu0 %v2556_v11 }
 0x329   : > { %2558 = vmatprep.subr.bf16.mxu0 %v2962_v44 }
 0x32c   : > { %2560 = vmatpush3.bf16.msra.mxu0 %v2559_v14 }
 0x32d   : > { %2561 = vmatprep.subr.bf16.mxu0 %v2962_v44 }
 0x330   : > { %2563 = vmatpush3.bf16.msra.mxu0 %v2562_v18 }
 0x331   : > { %2564 = vmatprep.subr.bf16.mxu0 %v2962_v44 }
 0x334   : > { %2566 = vmatpush3.bf16.msra.mxu0 %v2565_v21 }
 0x335   : > { %2567 = vmatprep.subr.bf16.mxu0 %v2962_v44 }
 0x337   : > { %2150 = vmatmul.mubr.f32.vlgmr.msra.gmra.mrb[12].mxu0 %v1484_v22 }
 0x338   : > { %2184 = vmatprep.mubr.msk.f32.mxu0 %vm2963_vm2, %v2961_v0  ;;  %2569 = vmatpush3.bf16.msra.mxu0 %v2568_v31  ;;  %v1689_v0 = vld [vmem:[#allocation12 + $0x40] sm:$0xff] }
 0x339   : > { %2570 = vmatprep.subr.bf16.mxu0 %v2962_v44  ;;  %v2580_v41 = vpack.c.bf16 %v1690_v40, %v1689_v0 }
 0x33c   : > { %2572 = vmatpush3.bf16.msra.mxu0 %v2571_v34 }
 0x33d   : > { %2573 = vmatprep.subr.bf16.mxu0 %v2962_v44 }
 0x340   : > { %2575 = vmatpush3.bf16.msra.mxu0 %v2574_v19 }
 0x341   : > { %2576 = vmatprep.subr.bf16.mxu0 %v2962_v44 }
 0x344   : > { %2578 = vmatpush3.bf16.msra.mxu0 %v2577_v39 }
 0x345   : > { %2579 = vmatprep.subr.bf16.mxu0 %v2962_v44 }
 0x348   : > { %2581 = vmatpush3.bf16.msra.mxu0 %v2580_v41 }
 0x349   : > { %2582 = vmatprep.subr.bf16.mxu0 %v2962_v44 }
 0x34c   : > { %2584 = vmatpush3.bf16.msra.mxu0 %v2583_v42 }
 0x34d   : > { %2585 = vmatprep.subr.bf16.mxu0 %v2962_v44 }
 0x350   : > { %2587 = vmatpush3.bf16.msra.mxu0 %v2586_v47 }
 0x351   : > { %2588 = vmatprep.subr.bf16.mxu0 %v2962_v44 }
 0x354   : > { %2590 = vmatpush3.bf16.msra.mxu0 %v2589_v50 }
 0x3ea   : > { %v2080_v45 = vpop.f32.mrb[10].mxu0 }
 0x3eb   : > { %v2081_v51 = vpop.f32.mrb[11].mxu0 }
 0x3ec   : > { %v2082_v52 = vadd.f32 %v2081_v51, %v2080_v45 }
 0x3ee   : > { %v1607_v56 = vadd.f32 %v2082_v52, %v1939_v54 }
 0x40a   : > { %v1676_v57 = vpop.f32.mrb[12].mxu0 }
 0x40b   : > { %v1677_v58 = vadd.f32 %v1676_v57, %v1607_v56  ;;  %v2151_v59 = vpop.f32.mrb[13].mxu0 }
 0x40d   : > { %v1680_v60 = vmax.f32 %v1677_v58, 0.0 }
 0x40f   : > { %2185 = vmatmul.mubr.f32.vlgmr.msra.gmra.mrb[14].mxu0 %v1680_v60 }
 0x4e2   : > { %v1770_v44 = vpop.f32.mrb[14].mxu0 }
 0x4e3   : > { %v1771_v62 = vadd.f32 %v1940_v61, %v1770_v44  ;;  %v2186_v63 = vpop.f32.mrb[15].mxu0 }
 0x4e5   : > { %1774 = vst [vmem:[%s436_s19] sm:$0xff] %v1771_v62 }
 0x4e6 PF: > { %s24_s30 = sadd.s32 1, %s2945_s30  }
 0x4e7   : > { %p21_p13 = scmp.ge.s32.totalorder %s24_s30, 4  }
 0x4e9   :  { %23 = sbr.rel (!%p21_p13) target bundleno = 5 (0x5), region = 119 }
 0x4f0   :  { %1794 = vsyncpa [#allocation3], 1 }
 0x4f1   :  { %1796 = vsyncpa [#allocation3 + $0x1], 1 }
 0x4f2   :  { %1797 = vsyncpa [#allocation5], 1 }
 0x4f3   :  { %1798 = vsyncpa [#allocation8], 1 }
 0x4f4   :  { %1799 = vsyncpa [#allocation11], 1 }
 0x4f5   :  { %1800 = vsyncpa [#allocation14], 1 }

</bundles_post_ra>
